<compile_context>
chip_gen: v6e
topology: v6e:2x2x1
jax: 0.10.0
libtpu: 0.0.40
codegen_flags: <defaults>
</compile_context>

<pallas_src>
import jax
import jax.numpy as jnp
import numpy as np
from jax.experimental import pallas as pl
from jax.experimental.pallas import tpu as pltpu

# ----------------------------- small CLIP config -----------------------------
IMAGE_SIZE = 16
PATCH_SIZE = 8
CHANNELS = 3
HIDDEN = 128
HEADS = 4
HEAD_DIM = HIDDEN // HEADS
INTERMEDIATE = 256
NUM_LAYERS = 2
SELECT_LAYER = -2          # args.mm_vision_select_layer
SELECT_FEATURE = "patch"   # args.mm_vision_select_feature
NUM_PATCHES = (IMAGE_SIZE // PATCH_SIZE) ** 2
SEQ = NUM_PATCHES + 1      # +1 for the CLS token
PATCH_DIM = CHANNELS * PATCH_SIZE * PATCH_SIZE
LN_EPS = 1e-5
SCALE = HEAD_DIM ** -0.5

# hidden_states = [pre-LN embeddings, layer_0_out, ..., layer_{N-1}_out]
# hidden_states[SELECT_LAYER] only needs the first LAYERS_RUN layers.
LAYERS_RUN = (NUM_LAYERS + 1 + SELECT_LAYER) if SELECT_LAYER < 0 else SELECT_LAYER
assert 1 <= LAYERS_RUN <= NUM_LAYERS

LAYER_KEYS = ("ln1_g", "ln1_b", "wq", "bq", "wk", "bk", "wv", "bv",
              "wo", "bo", "ln2_g", "ln2_b", "w1", "b1", "w2", "b2")


# ------------------------------ shared helpers --------------------------------
def _ln(x, g, b):
    mu = jnp.mean(x, axis=-1, keepdims=True)
    var = jnp.mean((x - mu) ** 2, axis=-1, keepdims=True)
    return (x - mu) * jax.lax.rsqrt(var + LN_EPS) * g + b


def _full_spec(shape):
    nd = len(shape)
    return pl.BlockSpec(shape, lambda b, nd=nd: (0,) * nd)


# ------------------------------- fused kernel ----------------------------------
def tower_kernel(pp_ref, pw_ref, emb_ref, preg_ref, preb_ref,
                 ln1g_ref, ln1b_ref, wq_ref, bq_ref, wk_ref, bk_ref,
                 wv_ref, bv_ref, wo_ref, bo_ref, ln2g_ref, ln2b_ref,
                 w1_ref, b1_ref, w2_ref, b2_ref, o_ref):
    # Patch-embed Conv2d(stride=patch, bias=False) as a single matmul.
    # Row 0 of the padded patch matrix is zeros, so the CLS position picks up
    # exactly emb[0] = cls + pos[0]; patch rows get patch_embed + pos[1:].
    x = jnp.dot(pp_ref[0], pw_ref[...],
                preferred_element_type=jnp.float32) + emb_ref[...]      # (S, D)
    x = _ln(x, preg_ref[...], preb_ref[...])                            # pre_layrnorm

    for l in range(LAYERS_RUN):                                         # static unroll
        # ----- self-attention block -----
        h = _ln(x, ln1g_ref[l], ln1b_ref[l])
        hb = h.astype(jnp.bfloat16)
        attn = bo_ref[l]                                                # (1, D) bias
        for hd in range(HEADS):                                         # static unroll
            # per-head weight slabs -> no 32-lane activation sub-slicing
            qh = jnp.dot(hb, wq_ref[l, hd],
                         preferred_element_type=jnp.float32) + bq_ref[l, hd]
            kh = jnp.dot(hb, wk_ref[l, hd],
                         preferred_element_type=jnp.float32) + bk_ref[l, hd]
            vh = jnp.dot(hb, wv_ref[l, hd],
                         preferred_element_type=jnp.float32) + bv_ref[l, hd]
            s = jnp.dot(qh, kh.T, preferred_element_type=jnp.float32)   # scale folded in wq
            s = s - jnp.max(s, axis=-1, keepdims=True)
            p = jnp.exp(s)
            p = p * pl.reciprocal(jnp.sum(p, axis=-1, keepdims=True), approx=True)
            oh = jnp.dot(p, vh, preferred_element_type=jnp.float32)     # (S, Hd)
            # lane-dense (S, Hd) @ (Hd, D) accumulation replaces concat + big matmul
            attn = attn + jnp.dot(oh.astype(jnp.bfloat16), wo_ref[l, hd],
                                  preferred_element_type=jnp.float32)
        x = x + attn

        # ----- MLP block -----
        h2 = _ln(x, ln2g_ref[l], ln2b_ref[l]).astype(jnp.bfloat16)
        m = jnp.dot(h2, w1_ref[l], preferred_element_type=jnp.float32) + b1_ref[l]
        m = m * jax.nn.sigmoid(1.702 * m)                               # quick_gelu
        x = x + jnp.dot(m.astype(jnp.bfloat16), w2_ref[l],
                        preferred_element_type=jnp.float32) + b2_ref[l]

    o_ref[0] = x[1:, :]                                                 # drop CLS ('patch')


# ------------------------------- glue (JAX) -------------------------------------
def build_padded_patches(images):
    # NCHW -> (B, SEQ, C*ps*ps); row 0 is all-zero (CLS slot), rows 1: are
    # row-major patches flattened (C, ph, pw) -- Conv2d(stride=patch) semantics.
    B, C, H, W = images.shape
    gh, gw = H // PATCH_SIZE, W // PATCH_SIZE
    x = images.reshape(B, C, gh, PATCH_SIZE, gw, PATCH_SIZE)
    x = x.transpose(0, 2, 4, 1, 3, 5)                       # (B, gh, gw, C, ps, ps)
    patches = x.reshape(B, gh * gw, C * PATCH_SIZE * PATCH_SIZE)
    zeros = jnp.zeros((B, 1, PATCH_DIM), patches.dtype)
    return jnp.concatenate([zeros, patches], axis=1)        # (B, S, PATCH_DIM)


@jax.jit
def clip_vision_tower_forward(images, kp):
    """Equivalent of CustomCLIPVisionTower.forward for a batched image tensor."""
    in_dtype = images.dtype
    x = images.astype(jnp.float32)                          # .to(self.dtype)
    pp = build_padded_patches(x).astype(jnp.bfloat16)
    B = pp.shape[0]

    layer_args = [kp[k][:LAYERS_RUN] for k in LAYER_KEYS]   # skip dead layers
    args = [pp, kp["patch_w"], kp["emb"], kp["pre_g"], kp["pre_b"]] + layer_args

    in_specs = [pl.BlockSpec((1, SEQ, PATCH_DIM), lambda b: (b, 0, 0))]
    in_specs += [_full_spec(a.shape) for a in args[1:]]

    feats = pl.pallas_call(
        tower_kernel,
        out_shape=jax.ShapeDtypeStruct((B, NUM_PATCHES, HIDDEN), jnp.float32),
        grid=(B,),
        in_specs=in_specs,
        out_specs=pl.BlockSpec((1, NUM_PATCHES, HIDDEN), lambda b: (b, 0, 0)),
        compiler_params=pltpu.CompilerParams(dimension_semantics=("parallel",)),
    )(*args)
    return feats.astype(in_dtype)


# ------------------------------ parameter init ---------------------------------
def init_canonical_params(key):
    std = 0.02
    keys = jax.random.split(key, 3 + NUM_LAYERS)
    params = dict(
        patch_w=jax.random.normal(keys[0], (PATCH_DIM, HIDDEN), jnp.float32) * std,
        cls=jax.random.normal(keys[1], (HIDDEN,), jnp.float32) * std,
        pos=jax.random.normal(keys[2], (SEQ, HIDDEN), jnp.float32) * std,
        pre_g=jnp.ones((1, HIDDEN), jnp.float32),
        pre_b=jnp.zeros((1, HIDDEN), jnp.float32),
        layers=[],
    )
    for l in range(NUM_LAYERS):
        k = jax.random.split(keys[3 + l], 10)
        params["layers"].append(dict(
            ln1_g=jnp.ones((1, HIDDEN), jnp.float32),
            ln1_b=jnp.zeros((1, HIDDEN), jnp.float32),
            wq=jax.random.normal(k[0], (HIDDEN, HIDDEN), jnp.float32) * std,
            bq=jax.random.normal(k[1], (1, HIDDEN), jnp.float32) * std,
            wk=jax.random.normal(k[2], (HIDDEN, HIDDEN), jnp.float32) * std,
            bk=jax.random.normal(k[3], (1, HIDDEN), jnp.float32) * std,
            wv=jax.random.normal(k[4], (HIDDEN, HIDDEN), jnp.float32) * std,
            bv=jax.random.normal(k[5], (1, HIDDEN), jnp.float32) * std,
            wo=jax.random.normal(k[6], (HIDDEN, HIDDEN), jnp.float32) * std,
            bo=jnp.zeros((1, HIDDEN), jnp.float32),
            ln2_g=jnp.ones((1, HIDDEN), jnp.float32),
            ln2_b=jnp.zeros((1, HIDDEN), jnp.float32),
            w1=jax.random.normal(k[7], (HIDDEN, INTERMEDIATE), jnp.float32) * std,
            b1=jnp.zeros((1, INTERMEDIATE), jnp.float32),
            w2=jax.random.normal(k[8], (INTERMEDIATE, HIDDEN), jnp.float32) * std,
            b2=jnp.zeros((1, HIDDEN), jnp.float32),
        ))
    return params


def prepare_params(cp):
    """Stack per-layer weights, split heads, fold q-scale, cast matmul weights to bf16."""
    def split_cols(w):    # (D, D) -> (H, D, Hd);  [hd] == w[:, hd*Hd:(hd+1)*Hd]
        return w.reshape(HIDDEN, HEADS, HEAD_DIM).transpose(1, 0, 2)

    def split_bias(b):    # (1, D) -> (H, 1, Hd)
        return b.reshape(HEADS, HEAD_DIM)[:, None, :]

    def split_rows(w):    # (D, D) -> (H, Hd, D);  [hd] == w[hd*Hd:(hd+1)*Hd, :]
        return w.reshape(HEADS, HEAD_DIM, HIDDEN)

    def stack(name, fn=lambda a: a):
        return jnp.stack([fn(lay[name]) for lay in cp["layers"]])

    emb = jnp.concatenate(
        [cp["cls"][None, :] + cp["pos"][0:1], cp["pos"][1:]], axis=0)   # (S, D)

    return dict(
        patch_w=cp["patch_w"].astype(jnp.bfloat16),
        emb=emb,
        pre_g=cp["pre_g"], pre_b=cp["pre_b"],
        ln1_g=stack("ln1_g"), ln1_b=stack("ln1_b"),
        wq=(stack("wq", split_cols) * SCALE).astype(jnp.bfloat16),      # scale folded
        bq=stack("bq", split_bias) * SCALE,                             # scale folded
        wk=stack("wk", split_cols).astype(jnp.bfloat16),
        bk=stack("bk", split_bias),
        wv=stack("wv", split_cols).astype(jnp.bfloat16),
        bv=stack("bv", split_bias),
        wo=stack("wo", split_rows).astype(jnp.bfloat16),
        bo=stack("bo"),
        ln2_g=stack("ln2_g"), ln2_b=stack("ln2_b"),
        w1=stack("w1").astype(jnp.bfloat16),
        b1=stack("b1"),
        w2=stack("w2").astype(jnp.bfloat16),
        b2=stack("b2"),
    )


# ---------------------------- pure-JAX reference ---------------------------------
def _ref_forward(images, kp):
    # Runs ALL NUM_LAYERS layers and then selects hidden_states[SELECT_LAYER],
    # which also validates that the kernel's dead-layer skip is exact.
    in_dtype = images.dtype
    x = images.astype(jnp.float32)
    pp = build_padded_patches(x).astype(jnp.bfloat16)
    h = jnp.einsum("bsc,cd->bsd", pp, kp["patch_w"],
                   preferred_element_type=jnp.float32) + kp["emb"][None]
    h = _ln(h, kp["pre_g"], kp["pre_b"])
    hs = [h]
    for l in range(NUM_LAYERS):
        z = _ln(h, kp["ln1_g"][l], kp["ln1_b"][l]).astype(jnp.bfloat16)
        q = jnp.einsum("bsd,hde->bhse", z, kp["wq"][l],
                       preferred_element_type=jnp.float32) + kp["bq"][l][None]
        k = jnp.einsum("bsd,hde->bhse", z, kp["wk"][l],
                       preferred_element_type=jnp.float32) + kp["bk"][l][None]
        v = jnp.einsum("bsd,hde->bhse", z, kp["wv"][l],
                       preferred_element_type=jnp.float32) + kp["bv"][l][None]
        s = jnp.einsum("bhqe,bhke->bhqk", q, k)
        p = jax.nn.softmax(s, axis=-1)
        o = jnp.einsum("bhqk,bhke->bhqe", p, v)
        attn = jnp.einsum("bhse,hed->bsd", o.astype(jnp.bfloat16), kp["wo"][l],
                          preferred_element_type=jnp.float32) + kp["bo"][l][None]
        h = h + attn
        z2 = _ln(h, kp["ln2_g"][l], kp["ln2_b"][l]).astype(jnp.bfloat16)
        m = jnp.einsum("bsd,di->bsi", z2, kp["w1"][l],
                       preferred_element_type=jnp.float32) + kp["b1"][l][None]
        m = m * jax.nn.sigmoid(1.702 * m)
        h = h + jnp.einsum("bsi,id->bsd", m.astype(jnp.bfloat16), kp["w2"][l],
                           preferred_element_type=jnp.float32) + kp["b2"][l][None]
        hs.append(h)
    feats = hs[SELECT_LAYER]
    if SELECT_FEATURE == "patch":
        feats = feats[:, 1:]
    return feats.astype(in_dtype)


# ------------------------------------ main ---------------------------------------
if __name__ == "__main__":
    key = jax.random.PRNGKey(0)
    k_param, k_img = jax.random.split(key)
    kp = prepare_params(init_canonical_params(k_param))

    B = 2
    images = jax.random.normal(k_img, (B, CHANNELS, IMAGE_SIZE, IMAGE_SIZE), jnp.float32)

    feats = jax.block_until_ready(clip_vision_tower_forward(images, kp))

    assert feats.shape == (B, NUM_PATCHES, HIDDEN), feats.shape
    assert feats.dtype == images.dtype
    assert bool(jnp.all(jnp.isfinite(feats)))

    ref = jax.block_until_ready(_ref_forward(images, kp))
    np.testing.assert_allclose(np.asarray(feats), np.asarray(ref), rtol=2e-2, atol=2e-2)

    print("KERNEL_OK")
</pallas_src>

<mosaic_0001>
module attributes {stable_mosaic.version = 11 : i64} {
  func.func @tower_kernel(%arg0: i32, %arg1: memref<1x5x192xbf16, #tpu.memory_space<vmem>>, %arg2: memref<192x128xbf16, #tpu.memory_space<vmem>>, %arg3: memref<5x128xf32, #tpu.memory_space<vmem>>, %arg4: memref<1x128xf32, #tpu.memory_space<vmem>>, %arg5: memref<1x128xf32, #tpu.memory_space<vmem>>, %arg6: memref<1x1x128xf32, #tpu.memory_space<vmem>>, %arg7: memref<1x1x128xf32, #tpu.memory_space<vmem>>, %arg8: memref<1x4x128x32xbf16, #tpu.memory_space<vmem>>, %arg9: memref<1x4x1x32xf32, #tpu.memory_space<vmem>>, %arg10: memref<1x4x128x32xbf16, #tpu.memory_space<vmem>>, %arg11: memref<1x4x1x32xf32, #tpu.memory_space<vmem>>, %arg12: memref<1x4x128x32xbf16, #tpu.memory_space<vmem>>, %arg13: memref<1x4x1x32xf32, #tpu.memory_space<vmem>>, %arg14: memref<1x4x32x128xbf16, #tpu.memory_space<vmem>>, %arg15: memref<1x1x128xf32, #tpu.memory_space<vmem>>, %arg16: memref<1x1x128xf32, #tpu.memory_space<vmem>>, %arg17: memref<1x1x128xf32, #tpu.memory_space<vmem>>, %arg18: memref<1x128x256xbf16, #tpu.memory_space<vmem>>, %arg19: memref<1x1x256xf32, #tpu.memory_space<vmem>>, %arg20: memref<1x256x128xbf16, #tpu.memory_space<vmem>>, %arg21: memref<1x1x128xf32, #tpu.memory_space<vmem>>, %arg22: memref<1x4x128xf32, #tpu.memory_space<vmem>>) attributes {dimension_semantics = [#tpu.dimension_semantics<parallel>], iteration_bounds = array<i64: 2>, scalar_prefetch = 0 : i64, scratch_operands = 0 : i64, tpu.core_type = #tpu.core_type<tc>, window_params = [{transform_indices = @transform_0, window_bounds = array<i64: 1, 5, 192>}, {pipeline_mode = #tpu.pipeline_mode<synchronous>, transform_indices = @transform_1, window_bounds = array<i64: 192, 128>}, {pipeline_mode = #tpu.pipeline_mode<synchronous>, transform_indices = @transform_2, window_bounds = array<i64: 5, 128>}, {pipeline_mode = #tpu.pipeline_mode<synchronous>, transform_indices = @transform_3, window_bounds = array<i64: 1, 128>}, {pipeline_mode = #tpu.pipeline_mode<synchronous>, transform_indices = @transform_4, window_bounds = array<i64: 1, 128>}, {pipeline_mode = #tpu.pipeline_mode<synchronous>, transform_indices = @transform_5, window_bounds = array<i64: 1, 1, 128>}, {pipeline_mode = #tpu.pipeline_mode<synchronous>, transform_indices = @transform_6, window_bounds = array<i64: 1, 1, 128>}, {pipeline_mode = #tpu.pipeline_mode<synchronous>, transform_indices = @transform_7, window_bounds = array<i64: 1, 4, 128, 32>}, {pipeline_mode = #tpu.pipeline_mode<synchronous>, transform_indices = @transform_8, window_bounds = array<i64: 1, 4, 1, 32>}, {pipeline_mode = #tpu.pipeline_mode<synchronous>, transform_indices = @transform_9, window_bounds = array<i64: 1, 4, 128, 32>}, {pipeline_mode = #tpu.pipeline_mode<synchronous>, transform_indices = @transform_10, window_bounds = array<i64: 1, 4, 1, 32>}, {pipeline_mode = #tpu.pipeline_mode<synchronous>, transform_indices = @transform_11, window_bounds = array<i64: 1, 4, 128, 32>}, {pipeline_mode = #tpu.pipeline_mode<synchronous>, transform_indices = @transform_12, window_bounds = array<i64: 1, 4, 1, 32>}, {pipeline_mode = #tpu.pipeline_mode<synchronous>, transform_indices = @transform_13, window_bounds = array<i64: 1, 4, 32, 128>}, {pipeline_mode = #tpu.pipeline_mode<synchronous>, transform_indices = @transform_14, window_bounds = array<i64: 1, 1, 128>}, {pipeline_mode = #tpu.pipeline_mode<synchronous>, transform_indices = @transform_15, window_bounds = array<i64: 1, 1, 128>}, {pipeline_mode = #tpu.pipeline_mode<synchronous>, transform_indices = @transform_16, window_bounds = array<i64: 1, 1, 128>}, {pipeline_mode = #tpu.pipeline_mode<synchronous>, transform_indices = @transform_17, window_bounds = array<i64: 1, 128, 256>}, {pipeline_mode = #tpu.pipeline_mode<synchronous>, transform_indices = @transform_18, window_bounds = array<i64: 1, 1, 256>}, {pipeline_mode = #tpu.pipeline_mode<synchronous>, transform_indices = @transform_19, window_bounds = array<i64: 1, 256, 128>}, {pipeline_mode = #tpu.pipeline_mode<synchronous>, transform_indices = @transform_20, window_bounds = array<i64: 1, 1, 128>}, {transform_indices = @transform_21, window_bounds = array<i64: 1, 4, 128>}]} {
    %c0 = arith.constant 0 : index
    %c0_0 = arith.constant 0 : index
    %c0_1 = arith.constant 0 : index
    %0 = vector.load %arg1[%c0, %c0_0, %c0_1] : memref<1x5x192xbf16, #tpu.memory_space<vmem>>, vector<1x5x192xbf16>
    %1 = vector.shape_cast %0 : vector<1x5x192xbf16> to vector<5x192xbf16>
    %c0_2 = arith.constant 0 : index
    %c0_3 = arith.constant 0 : index
    %2 = vector.load %arg2[%c0_2, %c0_3] : memref<192x128xbf16, #tpu.memory_space<vmem>>, vector<192x128xbf16>
    %cst = arith.constant dense<0.000000e+00> : vector<5x128xf32>
    %3 = tpu.matmul %1, %2, %cst {dimension_numbers = #tpu.dot_dimension_numbers<[1], [0], [0], [1], [0, 0, 1, 1], [], []>} : vector<5x192xbf16>, vector<192x128xbf16>, vector<5x128xf32> -> vector<5x128xf32>
    %c0_4 = arith.constant 0 : index
    %c0_5 = arith.constant 0 : index
    %4 = vector.load %arg3[%c0_4, %c0_5] : memref<5x128xf32, #tpu.memory_space<vmem>>, vector<5x128xf32>
    %5 = arith.addf %3, %4 : vector<5x128xf32>
    %c0_6 = arith.constant 0 : index
    %c0_7 = arith.constant 0 : index
    %6 = vector.load %arg4[%c0_6, %c0_7] : memref<1x128xf32, #tpu.memory_space<vmem>>, vector<1x128xf32>
    %c0_8 = arith.constant 0 : index
    %c0_9 = arith.constant 0 : index
    %7 = vector.load %arg5[%c0_8, %c0_9] : memref<1x128xf32, #tpu.memory_space<vmem>>, vector<1x128xf32>
    %cst_10 = arith.constant dense<0.000000e+00> : vector<5xf32>
    %8 = vector.multi_reduction <add>, %5, %cst_10 [1] : vector<5x128xf32> to vector<5xf32>
    %9 = vector.shape_cast %8 : vector<5xf32> to vector<5x1xf32>
    %cst_11 = arith.constant 1.280000e+02 : f32
    %10 = vector.broadcast %cst_11 : f32 to vector<5x1xf32>
    %11 = arith.divf %9, %10 : vector<5x1xf32>
    %12 = vector.broadcast %11 : vector<5x1xf32> to vector<5x128xf32>
    %13 = arith.subf %5, %12 : vector<5x128xf32>
    %14 = arith.mulf %13, %13 : vector<5x128xf32>
    %cst_12 = arith.constant dense<0.000000e+00> : vector<5xf32>
    %15 = vector.multi_reduction <add>, %14, %cst_12 [1] : vector<5x128xf32> to vector<5xf32>
    %16 = vector.shape_cast %15 : vector<5xf32> to vector<5x1xf32>
    %cst_13 = arith.constant 1.280000e+02 : f32
    %17 = vector.broadcast %cst_13 : f32 to vector<5x1xf32>
    %18 = arith.divf %16, %17 : vector<5x1xf32>
    %19 = vector.broadcast %11 : vector<5x1xf32> to vector<5x128xf32>
    %20 = arith.subf %5, %19 : vector<5x128xf32>
    %cst_14 = arith.constant 9.99999974E-6 : f32
    %21 = vector.broadcast %cst_14 : f32 to vector<5x1xf32>
    %22 = arith.addf %18, %21 : vector<5x1xf32>
    %23 = math.rsqrt %22 : vector<5x1xf32>
    %24 = vector.broadcast %23 : vector<5x1xf32> to vector<5x128xf32>
    %25 = arith.mulf %20, %24 : vector<5x128xf32>
    %26 = vector.broadcast %6 : vector<1x128xf32> to vector<5x128xf32>
    %27 = arith.mulf %25, %26 : vector<5x128xf32>
    %28 = vector.broadcast %7 : vector<1x128xf32> to vector<5x128xf32>
    %29 = arith.addf %27, %28 : vector<5x128xf32>
    %c0_15 = arith.constant 0 : index
    %c0_16 = arith.constant 0 : index
    %c0_17 = arith.constant 0 : index
    %30 = vector.load %arg6[%c0_15, %c0_16, %c0_17] : memref<1x1x128xf32, #tpu.memory_space<vmem>>, vector<1x1x128xf32>
    %31 = vector.shape_cast %30 : vector<1x1x128xf32> to vector<1x128xf32>
    %c0_18 = arith.constant 0 : index
    %c0_19 = arith.constant 0 : index
    %c0_20 = arith.constant 0 : index
    %32 = vector.load %arg7[%c0_18, %c0_19, %c0_20] : memref<1x1x128xf32, #tpu.memory_space<vmem>>, vector<1x1x128xf32>
    %33 = vector.shape_cast %32 : vector<1x1x128xf32> to vector<1x128xf32>
    %cst_21 = arith.constant dense<0.000000e+00> : vector<5xf32>
    %34 = vector.multi_reduction <add>, %29, %cst_21 [1] : vector<5x128xf32> to vector<5xf32>
    %35 = vector.shape_cast %34 : vector<5xf32> to vector<5x1xf32>
    %cst_22 = arith.constant 1.280000e+02 : f32
    %36 = vector.broadcast %cst_22 : f32 to vector<5x1xf32>
    %37 = arith.divf %35, %36 : vector<5x1xf32>
    %38 = vector.broadcast %37 : vector<5x1xf32> to vector<5x128xf32>
    %39 = arith.subf %29, %38 : vector<5x128xf32>
    %40 = arith.mulf %39, %39 : vector<5x128xf32>
    %cst_23 = arith.constant dense<0.000000e+00> : vector<5xf32>
    %41 = vector.multi_reduction <add>, %40, %cst_23 [1] : vector<5x128xf32> to vector<5xf32>
    %42 = vector.shape_cast %41 : vector<5xf32> to vector<5x1xf32>
    %cst_24 = arith.constant 1.280000e+02 : f32
    %43 = vector.broadcast %cst_24 : f32 to vector<5x1xf32>
    %44 = arith.divf %42, %43 : vector<5x1xf32>
    %45 = vector.broadcast %37 : vector<5x1xf32> to vector<5x128xf32>
    %46 = arith.subf %29, %45 : vector<5x128xf32>
    %cst_25 = arith.constant 9.99999974E-6 : f32
    %47 = vector.broadcast %cst_25 : f32 to vector<5x1xf32>
    %48 = arith.addf %44, %47 : vector<5x1xf32>
    %49 = math.rsqrt %48 : vector<5x1xf32>
    %50 = vector.broadcast %49 : vector<5x1xf32> to vector<5x128xf32>
    %51 = arith.mulf %46, %50 : vector<5x128xf32>
    %52 = vector.broadcast %31 : vector<1x128xf32> to vector<5x128xf32>
    %53 = arith.mulf %51, %52 : vector<5x128xf32>
    %54 = vector.broadcast %33 : vector<1x128xf32> to vector<5x128xf32>
    %55 = arith.addf %53, %54 : vector<5x128xf32>
    %56 = arith.truncf %55 : vector<5x128xf32> to vector<5x128xbf16>
    %c0_26 = arith.constant 0 : index
    %c0_27 = arith.constant 0 : index
    %c0_28 = arith.constant 0 : index
    %57 = vector.load %arg15[%c0_26, %c0_27, %c0_28] : memref<1x1x128xf32, #tpu.memory_space<vmem>>, vector<1x1x128xf32>
    %58 = vector.shape_cast %57 : vector<1x1x128xf32> to vector<1x128xf32>
    %c0_29 = arith.constant 0 : index
    %c0_30 = arith.constant 0 : index
    %c0_31 = arith.constant 0 : index
    %c0_32 = arith.constant 0 : index
    %59 = vector.load %arg8[%c0_29, %c0_30, %c0_31, %c0_32] : memref<1x4x128x32xbf16, #tpu.memory_space<vmem>>, vector<1x1x128x32xbf16>
    %60 = vector.shape_cast %59 : vector<1x1x128x32xbf16> to vector<128x32xbf16>
    %cst_33 = arith.constant dense<0.000000e+00> : vector<5x32xf32>
    %61 = tpu.matmul %56, %60, %cst_33 {dimension_numbers = #tpu.dot_dimension_numbers<[1], [0], [0], [1], [0, 0, 1, 1], [], []>} : vector<5x128xbf16>, vector<128x32xbf16>, vector<5x32xf32> -> vector<5x32xf32>
    %c0_34 = arith.constant 0 : index
    %c0_35 = arith.constant 0 : index
    %c0_36 = arith.constant 0 : index
    %c0_37 = arith.constant 0 : index
    %62 = vector.load %arg9[%c0_34, %c0_35, %c0_36, %c0_37] : memref<1x4x1x32xf32, #tpu.memory_space<vmem>>, vector<1x1x1x32xf32>
    %63 = vector.shape_cast %62 : vector<1x1x1x32xf32> to vector<1x32xf32>
    %64 = vector.broadcast %63 : vector<1x32xf32> to vector<5x32xf32>
    %65 = arith.addf %61, %64 : vector<5x32xf32>
    %c0_38 = arith.constant 0 : index
    %c0_39 = arith.constant 0 : index
    %c0_40 = arith.constant 0 : index
    %c0_41 = arith.constant 0 : index
    %66 = vector.load %arg10[%c0_38, %c0_39, %c0_40, %c0_41] : memref<1x4x128x32xbf16, #tpu.memory_space<vmem>>, vector<1x1x128x32xbf16>
    %67 = vector.shape_cast %66 : vector<1x1x128x32xbf16> to vector<128x32xbf16>
    %cst_42 = arith.constant dense<0.000000e+00> : vector<5x32xf32>
    %68 = tpu.matmul %56, %67, %cst_42 {dimension_numbers = #tpu.dot_dimension_numbers<[1], [0], [0], [1], [0, 0, 1, 1], [], []>} : vector<5x128xbf16>, vector<128x32xbf16>, vector<5x32xf32> -> vector<5x32xf32>
    %c0_43 = arith.constant 0 : index
    %c0_44 = arith.constant 0 : index
    %c0_45 = arith.constant 0 : index
    %c0_46 = arith.constant 0 : index
    %69 = vector.load %arg11[%c0_43, %c0_44, %c0_45, %c0_46] : memref<1x4x1x32xf32, #tpu.memory_space<vmem>>, vector<1x1x1x32xf32>
    %70 = vector.shape_cast %69 : vector<1x1x1x32xf32> to vector<1x32xf32>
    %71 = vector.broadcast %70 : vector<1x32xf32> to vector<5x32xf32>
    %72 = arith.addf %68, %71 : vector<5x32xf32>
    %c0_47 = arith.constant 0 : index
    %c0_48 = arith.constant 0 : index
    %c0_49 = arith.constant 0 : index
    %c0_50 = arith.constant 0 : index
    %73 = vector.load %arg12[%c0_47, %c0_48, %c0_49, %c0_50] : memref<1x4x128x32xbf16, #tpu.memory_space<vmem>>, vector<1x1x128x32xbf16>
    %74 = vector.shape_cast %73 : vector<1x1x128x32xbf16> to vector<128x32xbf16>
    %cst_51 = arith.constant dense<0.000000e+00> : vector<5x32xf32>
    %75 = tpu.matmul %56, %74, %cst_51 {dimension_numbers = #tpu.dot_dimension_numbers<[1], [0], [0], [1], [0, 0, 1, 1], [], []>} : vector<5x128xbf16>, vector<128x32xbf16>, vector<5x32xf32> -> vector<5x32xf32>
    %c0_52 = arith.constant 0 : index
    %c0_53 = arith.constant 0 : index
    %c0_54 = arith.constant 0 : index
    %c0_55 = arith.constant 0 : index
    %76 = vector.load %arg13[%c0_52, %c0_53, %c0_54, %c0_55] : memref<1x4x1x32xf32, #tpu.memory_space<vmem>>, vector<1x1x1x32xf32>
    %77 = vector.shape_cast %76 : vector<1x1x1x32xf32> to vector<1x32xf32>
    %78 = vector.broadcast %77 : vector<1x32xf32> to vector<5x32xf32>
    %79 = arith.addf %75, %78 : vector<5x32xf32>
    %80 = tpu.transpose %72, [1, 0] : vector<5x32xf32> -> vector<32x5xf32>
    %cst_56 = arith.constant dense<0.000000e+00> : vector<5x5xf32>
    %81 = tpu.matmul %65, %80, %cst_56 {dimension_numbers = #tpu.dot_dimension_numbers<[1], [0], [0], [1], [0, 0, 1, 1], [], []>} : vector<5x32xf32>, vector<32x5xf32>, vector<5x5xf32> -> vector<5x5xf32>
    %cst_57 = arith.constant dense<0xFF800000> : vector<5xf32>
    %82 = vector.multi_reduction <maximumf>, %81, %cst_57 [1] : vector<5x5xf32> to vector<5xf32>
    %83 = vector.shape_cast %82 : vector<5xf32> to vector<5x1xf32>
    %84 = vector.broadcast %83 : vector<5x1xf32> to vector<5x5xf32>
    %85 = arith.subf %81, %84 : vector<5x5xf32>
    %86 = math.exp %85 : vector<5x5xf32>
    %cst_58 = arith.constant dense<0.000000e+00> : vector<5xf32>
    %87 = vector.multi_reduction <add>, %86, %cst_58 [1] : vector<5x5xf32> to vector<5xf32>
    %88 = vector.shape_cast %87 : vector<5xf32> to vector<5x1xf32>
    %89 = tpu.reciprocal %88 {approx = true} : vector<5x1xf32> -> vector<5x1xf32>
    %90 = vector.broadcast %89 : vector<5x1xf32> to vector<5x5xf32>
    %91 = arith.mulf %86, %90 : vector<5x5xf32>
    %cst_59 = arith.constant dense<0.000000e+00> : vector<5x32xf32>
    %92 = tpu.matmul %91, %79, %cst_59 {dimension_numbers = #tpu.dot_dimension_numbers<[1], [0], [0], [1], [0, 0, 1, 1], [], []>} : vector<5x5xf32>, vector<5x32xf32>, vector<5x32xf32> -> vector<5x32xf32>
    %93 = arith.truncf %92 : vector<5x32xf32> to vector<5x32xbf16>
    %c0_60 = arith.constant 0 : index
    %c0_61 = arith.constant 0 : index
    %c0_62 = arith.constant 0 : index
    %c0_63 = arith.constant 0 : index
    %94 = vector.load %arg14[%c0_60, %c0_61, %c0_62, %c0_63] : memref<1x4x32x128xbf16, #tpu.memory_space<vmem>>, vector<1x1x32x128xbf16>
    %95 = vector.shape_cast %94 : vector<1x1x32x128xbf16> to vector<32x128xbf16>
    %cst_64 = arith.constant dense<0.000000e+00> : vector<5x128xf32>
    %96 = tpu.matmul %93, %95, %cst_64 {dimension_numbers = #tpu.dot_dimension_numbers<[1], [0], [0], [1], [0, 0, 1, 1], [], []>} : vector<5x32xbf16>, vector<32x128xbf16>, vector<5x128xf32> -> vector<5x128xf32>
    %97 = vector.broadcast %58 : vector<1x128xf32> to vector<5x128xf32>
    %98 = arith.addf %97, %96 : vector<5x128xf32>
    %c0_65 = arith.constant 0 : index
    %c1 = arith.constant 1 : index
    %c0_66 = arith.constant 0 : index
    %c0_67 = arith.constant 0 : index
    %99 = vector.load %arg8[%c0_65, %c1, %c0_66, %c0_67] : memref<1x4x128x32xbf16, #tpu.memory_space<vmem>>, vector<1x1x128x32xbf16>
    %100 = vector.shape_cast %99 : vector<1x1x128x32xbf16> to vector<128x32xbf16>
    %cst_68 = arith.constant dense<0.000000e+00> : vector<5x32xf32>
    %101 = tpu.matmul %56, %100, %cst_68 {dimension_numbers = #tpu.dot_dimension_numbers<[1], [0], [0], [1], [0, 0, 1, 1], [], []>} : vector<5x128xbf16>, vector<128x32xbf16>, vector<5x32xf32> -> vector<5x32xf32>
    %c0_69 = arith.constant 0 : index
    %c1_70 = arith.constant 1 : index
    %c0_71 = arith.constant 0 : index
    %c0_72 = arith.constant 0 : index
    %102 = vector.load %arg9[%c0_69, %c1_70, %c0_71, %c0_72] : memref<1x4x1x32xf32, #tpu.memory_space<vmem>>, vector<1x1x1x32xf32>
    %103 = vector.shape_cast %102 : vector<1x1x1x32xf32> to vector<1x32xf32>
    %104 = vector.broadcast %103 : vector<1x32xf32> to vector<5x32xf32>
    %105 = arith.addf %101, %104 : vector<5x32xf32>
    %c0_73 = arith.constant 0 : index
    %c1_74 = arith.constant 1 : index
    %c0_75 = arith.constant 0 : index
    %c0_76 = arith.constant 0 : index
    %106 = vector.load %arg10[%c0_73, %c1_74, %c0_75, %c0_76] : memref<1x4x128x32xbf16, #tpu.memory_space<vmem>>, vector<1x1x128x32xbf16>
    %107 = vector.shape_cast %106 : vector<1x1x128x32xbf16> to vector<128x32xbf16>
    %cst_77 = arith.constant dense<0.000000e+00> : vector<5x32xf32>
    %108 = tpu.matmul %56, %107, %cst_77 {dimension_numbers = #tpu.dot_dimension_numbers<[1], [0], [0], [1], [0, 0, 1, 1], [], []>} : vector<5x128xbf16>, vector<128x32xbf16>, vector<5x32xf32> -> vector<5x32xf32>
    %c0_78 = arith.constant 0 : index
    %c1_79 = arith.constant 1 : index
    %c0_80 = arith.constant 0 : index
    %c0_81 = arith.constant 0 : index
    %109 = vector.load %arg11[%c0_78, %c1_79, %c0_80, %c0_81] : memref<1x4x1x32xf32, #tpu.memory_space<vmem>>, vector<1x1x1x32xf32>
    %110 = vector.shape_cast %109 : vector<1x1x1x32xf32> to vector<1x32xf32>
    %111 = vector.broadcast %110 : vector<1x32xf32> to vector<5x32xf32>
    %112 = arith.addf %108, %111 : vector<5x32xf32>
    %c0_82 = arith.constant 0 : index
    %c1_83 = arith.constant 1 : index
    %c0_84 = arith.constant 0 : index
    %c0_85 = arith.constant 0 : index
    %113 = vector.load %arg12[%c0_82, %c1_83, %c0_84, %c0_85] : memref<1x4x128x32xbf16, #tpu.memory_space<vmem>>, vector<1x1x128x32xbf16>
    %114 = vector.shape_cast %113 : vector<1x1x128x32xbf16> to vector<128x32xbf16>
    %cst_86 = arith.constant dense<0.000000e+00> : vector<5x32xf32>
    %115 = tpu.matmul %56, %114, %cst_86 {dimension_numbers = #tpu.dot_dimension_numbers<[1], [0], [0], [1], [0, 0, 1, 1], [], []>} : vector<5x128xbf16>, vector<128x32xbf16>, vector<5x32xf32> -> vector<5x32xf32>
    %c0_87 = arith.constant 0 : index
    %c1_88 = arith.constant 1 : index
    %c0_89 = arith.constant 0 : index
    %c0_90 = arith.constant 0 : index
    %116 = vector.load %arg13[%c0_87, %c1_88, %c0_89, %c0_90] : memref<1x4x1x32xf32, #tpu.memory_space<vmem>>, vector<1x1x1x32xf32>
    %117 = vector.shape_cast %116 : vector<1x1x1x32xf32> to vector<1x32xf32>
    %118 = vector.broadcast %117 : vector<1x32xf32> to vector<5x32xf32>
    %119 = arith.addf %115, %118 : vector<5x32xf32>
    %120 = tpu.transpose %112, [1, 0] : vector<5x32xf32> -> vector<32x5xf32>
    %cst_91 = arith.constant dense<0.000000e+00> : vector<5x5xf32>
    %121 = tpu.matmul %105, %120, %cst_91 {dimension_numbers = #tpu.dot_dimension_numbers<[1], [0], [0], [1], [0, 0, 1, 1], [], []>} : vector<5x32xf32>, vector<32x5xf32>, vector<5x5xf32> -> vector<5x5xf32>
    %cst_92 = arith.constant dense<0xFF800000> : vector<5xf32>
    %122 = vector.multi_reduction <maximumf>, %121, %cst_92 [1] : vector<5x5xf32> to vector<5xf32>
    %123 = vector.shape_cast %122 : vector<5xf32> to vector<5x1xf32>
    %124 = vector.broadcast %123 : vector<5x1xf32> to vector<5x5xf32>
    %125 = arith.subf %121, %124 : vector<5x5xf32>
    %126 = math.exp %125 : vector<5x5xf32>
    %cst_93 = arith.constant dense<0.000000e+00> : vector<5xf32>
    %127 = vector.multi_reduction <add>, %126, %cst_93 [1] : vector<5x5xf32> to vector<5xf32>
    %128 = vector.shape_cast %127 : vector<5xf32> to vector<5x1xf32>
    %129 = tpu.reciprocal %128 {approx = true} : vector<5x1xf32> -> vector<5x1xf32>
    %130 = vector.broadcast %129 : vector<5x1xf32> to vector<5x5xf32>
    %131 = arith.mulf %126, %130 : vector<5x5xf32>
    %cst_94 = arith.constant dense<0.000000e+00> : vector<5x32xf32>
    %132 = tpu.matmul %131, %119, %cst_94 {dimension_numbers = #tpu.dot_dimension_numbers<[1], [0], [0], [1], [0, 0, 1, 1], [], []>} : vector<5x5xf32>, vector<5x32xf32>, vector<5x32xf32> -> vector<5x32xf32>
    %133 = arith.truncf %132 : vector<5x32xf32> to vector<5x32xbf16>
    %c0_95 = arith.constant 0 : index
    %c1_96 = arith.constant 1 : index
    %c0_97 = arith.constant 0 : index
    %c0_98 = arith.constant 0 : index
    %134 = vector.load %arg14[%c0_95, %c1_96, %c0_97, %c0_98] : memref<1x4x32x128xbf16, #tpu.memory_space<vmem>>, vector<1x1x32x128xbf16>
    %135 = vector.shape_cast %134 : vector<1x1x32x128xbf16> to vector<32x128xbf16>
    %cst_99 = arith.constant dense<0.000000e+00> : vector<5x128xf32>
    %136 = tpu.matmul %133, %135, %cst_99 {dimension_numbers = #tpu.dot_dimension_numbers<[1], [0], [0], [1], [0, 0, 1, 1], [], []>} : vector<5x32xbf16>, vector<32x128xbf16>, vector<5x128xf32> -> vector<5x128xf32>
    %137 = arith.addf %98, %136 : vector<5x128xf32>
    %c0_100 = arith.constant 0 : index
    %c2 = arith.constant 2 : index
    %c0_101 = arith.constant 0 : index
    %c0_102 = arith.constant 0 : index
    %138 = vector.load %arg8[%c0_100, %c2, %c0_101, %c0_102] : memref<1x4x128x32xbf16, #tpu.memory_space<vmem>>, vector<1x1x128x32xbf16>
    %139 = vector.shape_cast %138 : vector<1x1x128x32xbf16> to vector<128x32xbf16>
    %cst_103 = arith.constant dense<0.000000e+00> : vector<5x32xf32>
    %140 = tpu.matmul %56, %139, %cst_103 {dimension_numbers = #tpu.dot_dimension_numbers<[1], [0], [0], [1], [0, 0, 1, 1], [], []>} : vector<5x128xbf16>, vector<128x32xbf16>, vector<5x32xf32> -> vector<5x32xf32>
    %c0_104 = arith.constant 0 : index
    %c2_105 = arith.constant 2 : index
    %c0_106 = arith.constant 0 : index
    %c0_107 = arith.constant 0 : index
    %141 = vector.load %arg9[%c0_104, %c2_105, %c0_106, %c0_107] : memref<1x4x1x32xf32, #tpu.memory_space<vmem>>, vector<1x1x1x32xf32>
    %142 = vector.shape_cast %141 : vector<1x1x1x32xf32> to vector<1x32xf32>
    %143 = vector.broadcast %142 : vector<1x32xf32> to vector<5x32xf32>
    %144 = arith.addf %140, %143 : vector<5x32xf32>
    %c0_108 = arith.constant 0 : index
    %c2_109 = arith.constant 2 : index
    %c0_110 = arith.constant 0 : index
    %c0_111 = arith.constant 0 : index
    %145 = vector.load %arg10[%c0_108, %c2_109, %c0_110, %c0_111] : memref<1x4x128x32xbf16, #tpu.memory_space<vmem>>, vector<1x1x128x32xbf16>
    %146 = vector.shape_cast %145 : vector<1x1x128x32xbf16> to vector<128x32xbf16>
    %cst_112 = arith.constant dense<0.000000e+00> : vector<5x32xf32>
    %147 = tpu.matmul %56, %146, %cst_112 {dimension_numbers = #tpu.dot_dimension_numbers<[1], [0], [0], [1], [0, 0, 1, 1], [], []>} : vector<5x128xbf16>, vector<128x32xbf16>, vector<5x32xf32> -> vector<5x32xf32>
    %c0_113 = arith.constant 0 : index
    %c2_114 = arith.constant 2 : index
    %c0_115 = arith.constant 0 : index
    %c0_116 = arith.constant 0 : index
    %148 = vector.load %arg11[%c0_113, %c2_114, %c0_115, %c0_116] : memref<1x4x1x32xf32, #tpu.memory_space<vmem>>, vector<1x1x1x32xf32>
    %149 = vector.shape_cast %148 : vector<1x1x1x32xf32> to vector<1x32xf32>
    %150 = vector.broadcast %149 : vector<1x32xf32> to vector<5x32xf32>
    %151 = arith.addf %147, %150 : vector<5x32xf32>
    %c0_117 = arith.constant 0 : index
    %c2_118 = arith.constant 2 : index
    %c0_119 = arith.constant 0 : index
    %c0_120 = arith.constant 0 : index
    %152 = vector.load %arg12[%c0_117, %c2_118, %c0_119, %c0_120] : memref<1x4x128x32xbf16, #tpu.memory_space<vmem>>, vector<1x1x128x32xbf16>
    %153 = vector.shape_cast %152 : vector<1x1x128x32xbf16> to vector<128x32xbf16>
    %cst_121 = arith.constant dense<0.000000e+00> : vector<5x32xf32>
    %154 = tpu.matmul %56, %153, %cst_121 {dimension_numbers = #tpu.dot_dimension_numbers<[1], [0], [0], [1], [0, 0, 1, 1], [], []>} : vector<5x128xbf16>, vector<128x32xbf16>, vector<5x32xf32> -> vector<5x32xf32>
    %c0_122 = arith.constant 0 : index
    %c2_123 = arith.constant 2 : index
    %c0_124 = arith.constant 0 : index
    %c0_125 = arith.constant 0 : index
    %155 = vector.load %arg13[%c0_122, %c2_123, %c0_124, %c0_125] : memref<1x4x1x32xf32, #tpu.memory_space<vmem>>, vector<1x1x1x32xf32>
    %156 = vector.shape_cast %155 : vector<1x1x1x32xf32> to vector<1x32xf32>
    %157 = vector.broadcast %156 : vector<1x32xf32> to vector<5x32xf32>
    %158 = arith.addf %154, %157 : vector<5x32xf32>
    %159 = tpu.transpose %151, [1, 0] : vector<5x32xf32> -> vector<32x5xf32>
    %cst_126 = arith.constant dense<0.000000e+00> : vector<5x5xf32>
    %160 = tpu.matmul %144, %159, %cst_126 {dimension_numbers = #tpu.dot_dimension_numbers<[1], [0], [0], [1], [0, 0, 1, 1], [], []>} : vector<5x32xf32>, vector<32x5xf32>, vector<5x5xf32> -> vector<5x5xf32>
    %cst_127 = arith.constant dense<0xFF800000> : vector<5xf32>
    %161 = vector.multi_reduction <maximumf>, %160, %cst_127 [1] : vector<5x5xf32> to vector<5xf32>
    %162 = vector.shape_cast %161 : vector<5xf32> to vector<5x1xf32>
    %163 = vector.broadcast %162 : vector<5x1xf32> to vector<5x5xf32>
    %164 = arith.subf %160, %163 : vector<5x5xf32>
    %165 = math.exp %164 : vector<5x5xf32>
    %cst_128 = arith.constant dense<0.000000e+00> : vector<5xf32>
    %166 = vector.multi_reduction <add>, %165, %cst_128 [1] : vector<5x5xf32> to vector<5xf32>
    %167 = vector.shape_cast %166 : vector<5xf32> to vector<5x1xf32>
    %168 = tpu.reciprocal %167 {approx = true} : vector<5x1xf32> -> vector<5x1xf32>
    %169 = vector.broadcast %168 : vector<5x1xf32> to vector<5x5xf32>
    %170 = arith.mulf %165, %169 : vector<5x5xf32>
    %cst_129 = arith.constant dense<0.000000e+00> : vector<5x32xf32>
    %171 = tpu.matmul %170, %158, %cst_129 {dimension_numbers = #tpu.dot_dimension_numbers<[1], [0], [0], [1], [0, 0, 1, 1], [], []>} : vector<5x5xf32>, vector<5x32xf32>, vector<5x32xf32> -> vector<5x32xf32>
    %172 = arith.truncf %171 : vector<5x32xf32> to vector<5x32xbf16>
    %c0_130 = arith.constant 0 : index
    %c2_131 = arith.constant 2 : index
    %c0_132 = arith.constant 0 : index
    %c0_133 = arith.constant 0 : index
    %173 = vector.load %arg14[%c0_130, %c2_131, %c0_132, %c0_133] : memref<1x4x32x128xbf16, #tpu.memory_space<vmem>>, vector<1x1x32x128xbf16>
    %174 = vector.shape_cast %173 : vector<1x1x32x128xbf16> to vector<32x128xbf16>
    %cst_134 = arith.constant dense<0.000000e+00> : vector<5x128xf32>
    %175 = tpu.matmul %172, %174, %cst_134 {dimension_numbers = #tpu.dot_dimension_numbers<[1], [0], [0], [1], [0, 0, 1, 1], [], []>} : vector<5x32xbf16>, vector<32x128xbf16>, vector<5x128xf32> -> vector<5x128xf32>
    %176 = arith.addf %137, %175 : vector<5x128xf32>
    %c0_135 = arith.constant 0 : index
    %c3 = arith.constant 3 : index
    %c0_136 = arith.constant 0 : index
    %c0_137 = arith.constant 0 : index
    %177 = vector.load %arg8[%c0_135, %c3, %c0_136, %c0_137] : memref<1x4x128x32xbf16, #tpu.memory_space<vmem>>, vector<1x1x128x32xbf16>
    %178 = vector.shape_cast %177 : vector<1x1x128x32xbf16> to vector<128x32xbf16>
    %cst_138 = arith.constant dense<0.000000e+00> : vector<5x32xf32>
    %179 = tpu.matmul %56, %178, %cst_138 {dimension_numbers = #tpu.dot_dimension_numbers<[1], [0], [0], [1], [0, 0, 1, 1], [], []>} : vector<5x128xbf16>, vector<128x32xbf16>, vector<5x32xf32> -> vector<5x32xf32>
    %c0_139 = arith.constant 0 : index
    %c3_140 = arith.constant 3 : index
    %c0_141 = arith.constant 0 : index
    %c0_142 = arith.constant 0 : index
    %180 = vector.load %arg9[%c0_139, %c3_140, %c0_141, %c0_142] : memref<1x4x1x32xf32, #tpu.memory_space<vmem>>, vector<1x1x1x32xf32>
    %181 = vector.shape_cast %180 : vector<1x1x1x32xf32> to vector<1x32xf32>
    %182 = vector.broadcast %181 : vector<1x32xf32> to vector<5x32xf32>
    %183 = arith.addf %179, %182 : vector<5x32xf32>
    %c0_143 = arith.constant 0 : index
    %c3_144 = arith.constant 3 : index
    %c0_145 = arith.constant 0 : index
    %c0_146 = arith.constant 0 : index
    %184 = vector.load %arg10[%c0_143, %c3_144, %c0_145, %c0_146] : memref<1x4x128x32xbf16, #tpu.memory_space<vmem>>, vector<1x1x128x32xbf16>
    %185 = vector.shape_cast %184 : vector<1x1x128x32xbf16> to vector<128x32xbf16>
    %cst_147 = arith.constant dense<0.000000e+00> : vector<5x32xf32>
    %186 = tpu.matmul %56, %185, %cst_147 {dimension_numbers = #tpu.dot_dimension_numbers<[1], [0], [0], [1], [0, 0, 1, 1], [], []>} : vector<5x128xbf16>, vector<128x32xbf16>, vector<5x32xf32> -> vector<5x32xf32>
    %c0_148 = arith.constant 0 : index
    %c3_149 = arith.constant 3 : index
    %c0_150 = arith.constant 0 : index
    %c0_151 = arith.constant 0 : index
    %187 = vector.load %arg11[%c0_148, %c3_149, %c0_150, %c0_151] : memref<1x4x1x32xf32, #tpu.memory_space<vmem>>, vector<1x1x1x32xf32>
    %188 = vector.shape_cast %187 : vector<1x1x1x32xf32> to vector<1x32xf32>
    %189 = vector.broadcast %188 : vector<1x32xf32> to vector<5x32xf32>
    %190 = arith.addf %186, %189 : vector<5x32xf32>
    %c0_152 = arith.constant 0 : index
    %c3_153 = arith.constant 3 : index
    %c0_154 = arith.constant 0 : index
    %c0_155 = arith.constant 0 : index
    %191 = vector.load %arg12[%c0_152, %c3_153, %c0_154, %c0_155] : memref<1x4x128x32xbf16, #tpu.memory_space<vmem>>, vector<1x1x128x32xbf16>
    %192 = vector.shape_cast %191 : vector<1x1x128x32xbf16> to vector<128x32xbf16>
    %cst_156 = arith.constant dense<0.000000e+00> : vector<5x32xf32>
    %193 = tpu.matmul %56, %192, %cst_156 {dimension_numbers = #tpu.dot_dimension_numbers<[1], [0], [0], [1], [0, 0, 1, 1], [], []>} : vector<5x128xbf16>, vector<128x32xbf16>, vector<5x32xf32> -> vector<5x32xf32>
    %c0_157 = arith.constant 0 : index
    %c3_158 = arith.constant 3 : index
    %c0_159 = arith.constant 0 : index
    %c0_160 = arith.constant 0 : index
    %194 = vector.load %arg13[%c0_157, %c3_158, %c0_159, %c0_160] : memref<1x4x1x32xf32, #tpu.memory_space<vmem>>, vector<1x1x1x32xf32>
    %195 = vector.shape_cast %194 : vector<1x1x1x32xf32> to vector<1x32xf32>
    %196 = vector.broadcast %195 : vector<1x32xf32> to vector<5x32xf32>
    %197 = arith.addf %193, %196 : vector<5x32xf32>
    %198 = tpu.transpose %190, [1, 0] : vector<5x32xf32> -> vector<32x5xf32>
    %cst_161 = arith.constant dense<0.000000e+00> : vector<5x5xf32>
    %199 = tpu.matmul %183, %198, %cst_161 {dimension_numbers = #tpu.dot_dimension_numbers<[1], [0], [0], [1], [0, 0, 1, 1], [], []>} : vector<5x32xf32>, vector<32x5xf32>, vector<5x5xf32> -> vector<5x5xf32>
    %cst_162 = arith.constant dense<0xFF800000> : vector<5xf32>
    %200 = vector.multi_reduction <maximumf>, %199, %cst_162 [1] : vector<5x5xf32> to vector<5xf32>
    %201 = vector.shape_cast %200 : vector<5xf32> to vector<5x1xf32>
    %202 = vector.broadcast %201 : vector<5x1xf32> to vector<5x5xf32>
    %203 = arith.subf %199, %202 : vector<5x5xf32>
    %204 = math.exp %203 : vector<5x5xf32>
    %cst_163 = arith.constant dense<0.000000e+00> : vector<5xf32>
    %205 = vector.multi_reduction <add>, %204, %cst_163 [1] : vector<5x5xf32> to vector<5xf32>
    %206 = vector.shape_cast %205 : vector<5xf32> to vector<5x1xf32>
    %207 = tpu.reciprocal %206 {approx = true} : vector<5x1xf32> -> vector<5x1xf32>
    %208 = vector.broadcast %207 : vector<5x1xf32> to vector<5x5xf32>
    %209 = arith.mulf %204, %208 : vector<5x5xf32>
    %cst_164 = arith.constant dense<0.000000e+00> : vector<5x32xf32>
    %210 = tpu.matmul %209, %197, %cst_164 {dimension_numbers = #tpu.dot_dimension_numbers<[1], [0], [0], [1], [0, 0, 1, 1], [], []>} : vector<5x5xf32>, vector<5x32xf32>, vector<5x32xf32> -> vector<5x32xf32>
    %211 = arith.truncf %210 : vector<5x32xf32> to vector<5x32xbf16>
    %c0_165 = arith.constant 0 : index
    %c3_166 = arith.constant 3 : index
    %c0_167 = arith.constant 0 : index
    %c0_168 = arith.constant 0 : index
    %212 = vector.load %arg14[%c0_165, %c3_166, %c0_167, %c0_168] : memref<1x4x32x128xbf16, #tpu.memory_space<vmem>>, vector<1x1x32x128xbf16>
    %213 = vector.shape_cast %212 : vector<1x1x32x128xbf16> to vector<32x128xbf16>
    %cst_169 = arith.constant dense<0.000000e+00> : vector<5x128xf32>
    %214 = tpu.matmul %211, %213, %cst_169 {dimension_numbers = #tpu.dot_dimension_numbers<[1], [0], [0], [1], [0, 0, 1, 1], [], []>} : vector<5x32xbf16>, vector<32x128xbf16>, vector<5x128xf32> -> vector<5x128xf32>
    %215 = arith.addf %176, %214 : vector<5x128xf32>
    %216 = arith.addf %29, %215 : vector<5x128xf32>
    %c0_170 = arith.constant 0 : index
    %c0_171 = arith.constant 0 : index
    %c0_172 = arith.constant 0 : index
    %217 = vector.load %arg16[%c0_170, %c0_171, %c0_172] : memref<1x1x128xf32, #tpu.memory_space<vmem>>, vector<1x1x128xf32>
    %218 = vector.shape_cast %217 : vector<1x1x128xf32> to vector<1x128xf32>
    %c0_173 = arith.constant 0 : index
    %c0_174 = arith.constant 0 : index
    %c0_175 = arith.constant 0 : index
    %219 = vector.load %arg17[%c0_173, %c0_174, %c0_175] : memref<1x1x128xf32, #tpu.memory_space<vmem>>, vector<1x1x128xf32>
    %220 = vector.shape_cast %219 : vector<1x1x128xf32> to vector<1x128xf32>
    %cst_176 = arith.constant dense<0.000000e+00> : vector<5xf32>
    %221 = vector.multi_reduction <add>, %216, %cst_176 [1] : vector<5x128xf32> to vector<5xf32>
    %222 = vector.shape_cast %221 : vector<5xf32> to vector<5x1xf32>
    %cst_177 = arith.constant 1.280000e+02 : f32
    %223 = vector.broadcast %cst_177 : f32 to vector<5x1xf32>
    %224 = arith.divf %222, %223 : vector<5x1xf32>
    %225 = vector.broadcast %224 : vector<5x1xf32> to vector<5x128xf32>
    %226 = arith.subf %216, %225 : vector<5x128xf32>
    %227 = arith.mulf %226, %226 : vector<5x128xf32>
    %cst_178 = arith.constant dense<0.000000e+00> : vector<5xf32>
    %228 = vector.multi_reduction <add>, %227, %cst_178 [1] : vector<5x128xf32> to vector<5xf32>
    %229 = vector.shape_cast %228 : vector<5xf32> to vector<5x1xf32>
    %cst_179 = arith.constant 1.280000e+02 : f32
    %230 = vector.broadcast %cst_179 : f32 to vector<5x1xf32>
    %231 = arith.divf %229, %230 : vector<5x1xf32>
    %232 = vector.broadcast %224 : vector<5x1xf32> to vector<5x128xf32>
    %233 = arith.subf %216, %232 : vector<5x128xf32>
    %cst_180 = arith.constant 9.99999974E-6 : f32
    %234 = vector.broadcast %cst_180 : f32 to vector<5x1xf32>
    %235 = arith.addf %231, %234 : vector<5x1xf32>
    %236 = math.rsqrt %235 : vector<5x1xf32>
    %237 = vector.broadcast %236 : vector<5x1xf32> to vector<5x128xf32>
    %238 = arith.mulf %233, %237 : vector<5x128xf32>
    %239 = vector.broadcast %218 : vector<1x128xf32> to vector<5x128xf32>
    %240 = arith.mulf %238, %239 : vector<5x128xf32>
    %241 = vector.broadcast %220 : vector<1x128xf32> to vector<5x128xf32>
    %242 = arith.addf %240, %241 : vector<5x128xf32>
    %243 = arith.truncf %242 : vector<5x128xf32> to vector<5x128xbf16>
    %c0_181 = arith.constant 0 : index
    %c0_182 = arith.constant 0 : index
    %c0_183 = arith.constant 0 : index
    %244 = vector.load %arg18[%c0_181, %c0_182, %c0_183] : memref<1x128x256xbf16, #tpu.memory_space<vmem>>, vector<1x128x256xbf16>
    %245 = vector.shape_cast %244 : vector<1x128x256xbf16> to vector<128x256xbf16>
    %cst_184 = arith.constant dense<0.000000e+00> : vector<5x256xf32>
    %246 = tpu.matmul %243, %245, %cst_184 {dimension_numbers = #tpu.dot_dimension_numbers<[1], [0], [0], [1], [0, 0, 1, 1], [], []>} : vector<5x128xbf16>, vector<128x256xbf16>, vector<5x256xf32> -> vector<5x256xf32>
    %c0_185 = arith.constant 0 : index
    %c0_186 = arith.constant 0 : index
    %c0_187 = arith.constant 0 : index
    %247 = vector.load %arg19[%c0_185, %c0_186, %c0_187] : memref<1x1x256xf32, #tpu.memory_space<vmem>>, vector<1x1x256xf32>
    %248 = vector.shape_cast %247 : vector<1x1x256xf32> to vector<1x256xf32>
    %249 = vector.broadcast %248 : vector<1x256xf32> to vector<5x256xf32>
    %250 = arith.addf %246, %249 : vector<5x256xf32>
    %cst_188 = arith.constant 1.702000e+00 : f32
    %251 = vector.broadcast %cst_188 : f32 to vector<5x256xf32>
    %252 = arith.mulf %251, %250 : vector<5x256xf32>
    %253 = arith.negf %252 : vector<5x256xf32>
    %254 = math.exp %253 : vector<5x256xf32>
    %cst_189 = arith.constant 1.000000e+00 : f32
    %255 = vector.broadcast %cst_189 : f32 to vector<5x256xf32>
    %256 = arith.addf %255, %254 : vector<5x256xf32>
    %257 = arith.divf %255, %256 : vector<5x256xf32>
    %258 = arith.mulf %250, %257 : vector<5x256xf32>
    %259 = arith.truncf %258 : vector<5x256xf32> to vector<5x256xbf16>
    %c0_190 = arith.constant 0 : index
    %c0_191 = arith.constant 0 : index
    %c0_192 = arith.constant 0 : index
    %260 = vector.load %arg20[%c0_190, %c0_191, %c0_192] : memref<1x256x128xbf16, #tpu.memory_space<vmem>>, vector<1x256x128xbf16>
    %261 = vector.shape_cast %260 : vector<1x256x128xbf16> to vector<256x128xbf16>
    %cst_193 = arith.constant dense<0.000000e+00> : vector<5x128xf32>
    %262 = tpu.matmul %259, %261, %cst_193 {dimension_numbers = #tpu.dot_dimension_numbers<[1], [0], [0], [1], [0, 0, 1, 1], [], []>} : vector<5x256xbf16>, vector<256x128xbf16>, vector<5x128xf32> -> vector<5x128xf32>
    %263 = arith.addf %216, %262 : vector<5x128xf32>
    %c0_194 = arith.constant 0 : index
    %c0_195 = arith.constant 0 : index
    %c0_196 = arith.constant 0 : index
    %264 = vector.load %arg21[%c0_194, %c0_195, %c0_196] : memref<1x1x128xf32, #tpu.memory_space<vmem>>, vector<1x1x128xf32>
    %265 = vector.shape_cast %264 : vector<1x1x128xf32> to vector<1x128xf32>
    %266 = vector.broadcast %265 : vector<1x128xf32> to vector<5x128xf32>
    %267 = arith.addf %263, %266 : vector<5x128xf32>
    %268 = vector.extract_strided_slice %267 {offsets = [1, 0], sizes = [4, 128], strides = [1, 1]} : vector<5x128xf32> to vector<4x128xf32>
    %c0_197 = arith.constant 0 : index
    %c0_198 = arith.constant 0 : index
    %c0_199 = arith.constant 0 : index
    %269 = vector.load %arg22[%c0_197, %c0_198, %c0_199] : memref<1x4x128xf32, #tpu.memory_space<vmem>>, vector<1x4x128xf32>
    %270 = vector.shape_cast %269 : vector<1x4x128xf32> to vector<4x128xf32>
    %271 = vector.shape_cast %268 : vector<4x128xf32> to vector<1x4x128xf32>
    tpu.vector_store %arg22[%c0_197, %c0_198, %c0_199], %271 {strides = array<i32>} : memref<1x4x128xf32, #tpu.memory_space<vmem>>, vector<1x4x128xf32>,
    return
  }
  func.func @transform_0(%arg0: i32) -> (i32, i32, i32) {
    %c0_i32 = arith.constant 0 : i32
    %c0_i32_0 = arith.constant 0 : i32
    %c0_i32_1 = arith.constant 0 : i32
    return %arg0, %c0_i32, %c0_i32_0 : i32, i32, i32
  }
  func.func @transform_1(%arg0: i32) -> (i32, i32) {
    %c0_i32 = arith.constant 0 : i32
    %c0_i32_0 = arith.constant 0 : i32
    %c0_i32_1 = arith.constant 0 : i32
    return %c0_i32, %c0_i32_0 : i32, i32
  }
  func.func @transform_2(%arg0: i32) -> (i32, i32) {
    %c0_i32 = arith.constant 0 : i32
    %c0_i32_0 = arith.constant 0 : i32
    %c0_i32_1 = arith.constant 0 : i32
    return %c0_i32, %c0_i32_0 : i32, i32
  }
  func.func @transform_3(%arg0: i32) -> (i32, i32) {
    %c0_i32 = arith.constant 0 : i32
    %c0_i32_0 = arith.constant 0 : i32
    %c0_i32_1 = arith.constant 0 : i32
    return %c0_i32, %c0_i32_0 : i32, i32
  }
  func.func @transform_4(%arg0: i32) -> (i32, i32) {
    %c0_i32 = arith.constant 0 : i32
    %c0_i32_0 = arith.constant 0 : i32
    %c0_i32_1 = arith.constant 0 : i32
    return %c0_i32, %c0_i32_0 : i32, i32
  }
  func.func @transform_5(%arg0: i32) -> (i32, i32, i32) {
    %c0_i32 = arith.constant 0 : i32
    %c0_i32_0 = arith.constant 0 : i32
    %c0_i32_1 = arith.constant 0 : i32
    %c0_i32_2 = arith.constant 0 : i32
    return %c0_i32, %c0_i32_0, %c0_i32_1 : i32, i32, i32
  }
  func.func @transform_6(%arg0: i32) -> (i32, i32, i32) {
    %c0_i32 = arith.constant 0 : i32
    %c0_i32_0 = arith.constant 0 : i32
    %c0_i32_1 = arith.constant 0 : i32
    %c0_i32_2 = arith.constant 0 : i32
    return %c0_i32, %c0_i32_0, %c0_i32_1 : i32, i32, i32
  }
  func.func @transform_7(%arg0: i32) -> (i32, i32, i32, i32) {
    %c0_i32 = arith.constant 0 : i32
    %c0_i32_0 = arith.constant 0 : i32
    %c0_i32_1 = arith.constant 0 : i32
    %c0_i32_2 = arith.constant 0 : i32
    %c0_i32_3 = arith.constant 0 : i32
    return %c0_i32, %c0_i32_0, %c0_i32_1, %c0_i32_2 : i32, i32, i32, i32
  }
  func.func @transform_8(%arg0: i32) -> (i32, i32, i32, i32) {
    %c0_i32 = arith.constant 0 : i32
    %c0_i32_0 = arith.constant 0 : i32
    %c0_i32_1 = arith.constant 0 : i32
    %c0_i32_2 = arith.constant 0 : i32
    %c0_i32_3 = arith.constant 0 : i32
    return %c0_i32, %c0_i32_0, %c0_i32_1, %c0_i32_2 : i32, i32, i32, i32
  }
  func.func @transform_9(%arg0: i32) -> (i32, i32, i32, i32) {
    %c0_i32 = arith.constant 0 : i32
    %c0_i32_0 = arith.constant 0 : i32
    %c0_i32_1 = arith.constant 0 : i32
    %c0_i32_2 = arith.constant 0 : i32
    %c0_i32_3 = arith.constant 0 : i32
    return %c0_i32, %c0_i32_0, %c0_i32_1, %c0_i32_2 : i32, i32, i32, i32
  }
  func.func @transform_10(%arg0: i32) -> (i32, i32, i32, i32) {
    %c0_i32 = arith.constant 0 : i32
    %c0_i32_0 = arith.constant 0 : i32
    %c0_i32_1 = arith.constant 0 : i32
    %c0_i32_2 = arith.constant 0 : i32
    %c0_i32_3 = arith.constant 0 : i32
    return %c0_i32, %c0_i32_0, %c0_i32_1, %c0_i32_2 : i32, i32, i32, i32
  }
  func.func @transform_11(%arg0: i32) -> (i32, i32, i32, i32) {
    %c0_i32 = arith.constant 0 : i32
    %c0_i32_0 = arith.constant 0 : i32
    %c0_i32_1 = arith.constant 0 : i32
    %c0_i32_2 = arith.constant 0 : i32
    %c0_i32_3 = arith.constant 0 : i32
    return %c0_i32, %c0_i32_0, %c0_i32_1, %c0_i32_2 : i32, i32, i32, i32
  }
  func.func @transform_12(%arg0: i32) -> (i32, i32, i32, i32) {
    %c0_i32 = arith.constant 0 : i32
    %c0_i32_0 = arith.constant 0 : i32
    %c0_i32_1 = arith.constant 0 : i32
    %c0_i32_2 = arith.constant 0 : i32
    %c0_i32_3 = arith.constant 0 : i32
    return %c0_i32, %c0_i32_0, %c0_i32_1, %c0_i32_2 : i32, i32, i32, i32
  }
  func.func @transform_13(%arg0: i32) -> (i32, i32, i32, i32) {
    %c0_i32 = arith.constant 0 : i32
    %c0_i32_0 = arith.constant 0 : i32
    %c0_i32_1 = arith.constant 0 : i32
    %c0_i32_2 = arith.constant 0 : i32
    %c0_i32_3 = arith.constant 0 : i32
    return %c0_i32, %c0_i32_0, %c0_i32_1, %c0_i32_2 : i32, i32, i32, i32
  }
  func.func @transform_14(%arg0: i32) -> (i32, i32, i32) {
    %c0_i32 = arith.constant 0 : i32
    %c0_i32_0 = arith.constant 0 : i32
    %c0_i32_1 = arith.constant 0 : i32
    %c0_i32_2 = arith.constant 0 : i32
    return %c0_i32, %c0_i32_0, %c0_i32_1 : i32, i32, i32
  }
  func.func @transform_15(%arg0: i32) -> (i32, i32, i32) {
    %c0_i32 = arith.constant 0 : i32
    %c0_i32_0 = arith.constant 0 : i32
    %c0_i32_1 = arith.constant 0 : i32
    %c0_i32_2 = arith.constant 0 : i32
    return %c0_i32, %c0_i32_0, %c0_i32_1 : i32, i32, i32
  }
  func.func @transform_16(%arg0: i32) -> (i32, i32, i32) {
    %c0_i32 = arith.constant 0 : i32
    %c0_i32_0 = arith.constant 0 : i32
    %c0_i32_1 = arith.constant 0 : i32
    %c0_i32_2 = arith.constant 0 : i32
    return %c0_i32, %c0_i32_0, %c0_i32_1 : i32, i32, i32
  }
  func.func @transform_17(%arg0: i32) -> (i32, i32, i32) {
    %c0_i32 = arith.constant 0 : i32
    %c0_i32_0 = arith.constant 0 : i32
    %c0_i32_1 = arith.constant 0 : i32
    %c0_i32_2 = arith.constant 0 : i32
    return %c0_i32, %c0_i32_0, %c0_i32_1 : i32, i32, i32
  }
  func.func @transform_18(%arg0: i32) -> (i32, i32, i32) {
    %c0_i32 = arith.constant 0 : i32
    %c0_i32_0 = arith.constant 0 : i32
    %c0_i32_1 = arith.constant 0 : i32
    %c0_i32_2 = arith.constant 0 : i32
    return %c0_i32, %c0_i32_0, %c0_i32_1 : i32, i32, i32
  }
  func.func @transform_19(%arg0: i32) -> (i32, i32, i32) {
    %c0_i32 = arith.constant 0 : i32
    %c0_i32_0 = arith.constant 0 : i32
    %c0_i32_1 = arith.constant 0 : i32
    %c0_i32_2 = arith.constant 0 : i32
    return %c0_i32, %c0_i32_0, %c0_i32_1 : i32, i32, i32
  }
  func.func @transform_20(%arg0: i32) -> (i32, i32, i32) {
    %c0_i32 = arith.constant 0 : i32
    %c0_i32_0 = arith.constant 0 : i32
    %c0_i32_1 = arith.constant 0 : i32
    %c0_i32_2 = arith.constant 0 : i32
    return %c0_i32, %c0_i32_0, %c0_i32_1 : i32, i32, i32
  }
  func.func @transform_21(%arg0: i32) -> (i32, i32, i32) {
    %c0_i32 = arith.constant 0 : i32
    %c0_i32_0 = arith.constant 0 : i32
    %c0_i32_1 = arith.constant 0 : i32
    return %arg0, %c0_i32, %c0_i32_0 : i32, i32, i32
  }
}

</mosaic_0001>

<bundles_post_ra>
// kernel: clip_vision_tower_forward.1
= control target key start
LH: loop header
LB: loop body
LE: loop exit
PB: predicated region body
PF: predicated region fallthrough
CT: control target
= control target key end

     0   :  { %s5659_s0 = inlined_call_operand.vmem [shape: bf16[2,5,192], index: 0, kind: input, shape index: {}]   ;;  %s5660_s1 = inlined_call_operand.vmem [shape: bf16[192,128], index: 1, kind: input, shape index: {}]   ;;  %s5661_s2 = inlined_call_operand.vmem [shape: f32[5,128], index: 2, kind: input, shape index: {}]   ;;  %s5662_s3 = inlined_call_operand.vmem [shape: f32[1,128], index: 3, kind: input, shape index: {}]   ;;  %s5663_s4 = inlined_call_operand.vmem [shape: f32[1,128], index: 4, kind: input, shape index: {}]   ;;  %s5664_s5 = inlined_call_operand.vmem [shape: f32[1,1,128], index: 5, kind: input, shape index: {}]   ;;  %s5665_s6 = inlined_call_operand.vmem [shape: f32[1,1,128], index: 6, kind: input, shape index: {}]   ;;  %s5666_s7 = inlined_call_operand.vmem [shape: bf16[1,4,128,32], index: 7, kind: input, shape index: {}]   ;;  %s5667_s8 = inlined_call_operand.vmem [shape: f32[1,4,1,32], index: 8, kind: input, shape index: {}]   ;;  %s5668_s9 = inlined_call_operand.vmem [shape: bf16[1,4,128,32], index: 9, kind: input, shape index: {}]   ;;  %s5669_s10 = inlined_call_operand.vmem [shape: f32[1,4,1,32], index: 10, kind: input, shape index: {}]   ;;  %s5670_s11 = inlined_call_operand.vmem [shape: bf16[1,4,128,32], index: 11, kind: input, shape index: {}]   ;;  %s5671_s12 = inlined_call_operand.vmem [shape: f32[1,4,1,32], index: 12, kind: input, shape index: {}]   ;;  %s5672_s13 = inlined_call_operand.vmem [shape: bf16[1,4,32,128], index: 13, kind: input, shape index: {}]   ;;  %s5673_s14 = inlined_call_operand.vmem [shape: f32[1,1,128], index: 14, kind: input, shape index: {}]   ;;  %s5674_s15 = inlined_call_operand.vmem [shape: f32[1,1,128], index: 15, kind: input, shape index: {}]   ;;  %s5675_s16 = inlined_call_operand.vmem [shape: f32[1,1,128], index: 16, kind: input, shape index: {}]   ;;  %s5676_s17 = inlined_call_operand.vmem [shape: bf16[1,128,256], index: 17, kind: input, shape index: {}]   ;;  %s5677_s18 = inlined_call_operand.vmem [shape: f32[1,1,256], index: 18, kind: input, shape index: {}]   ;;  %s5678_s19 = inlined_call_operand.vmem [shape: bf16[1,256,128], index: 19, kind: input, shape index: {}]   ;;  %s5679_s20 = inlined_call_operand.vmem [shape: f32[1,1,128], index: 20, kind: input, shape index: {}]   ;;  %s5680_s21 = inlined_call_operand.hbm [shape: f32[2,4,128], index: 21, kind: output, shape index: {}]  }
   0x1   :  { %5689 = sst [smem:[#allocation11_spill]] %s5659_s0 }
   0x2   :  { %5690 = sst [smem:[#allocation12_spill]] %s5660_s1 }
   0x3   :  { %5691 = sst [smem:[#allocation13_spill]] %s5661_s2 }
   0x4   :  { %5692 = sst [smem:[#allocation14_spill]] %s5662_s3 }
   0x5   :  { %5693 = sst [smem:[#allocation15_spill]] %s5663_s4 }
   0x6   :  { %5694 = sst [smem:[#allocation16_spill]] %s5664_s5 }
   0x7   :  { %5695 = sst [smem:[#allocation17_spill]] %s5665_s6 }
   0x8   :  { %5696 = sst [smem:[#allocation18_spill]] %s5680_s21 }
   0x9   :  { %26 = vsyncpa [#allocation3], 0 }
   0xa   :  { %28 = vsyncpa [#allocation3 + $0x1], 0  ;;  %s4819_s2 = smov 0   ;;  %s4821_s25 = smov 0  }
   0xb   :  { %s4823_s26 = smov 0   ;;  %s4825_s27 = smov 0  }
   0xc LB: > { %5697 = sst [smem:[#allocation5_spill]] %s4691_s2  ;;  %s4840_s3 = sadd.s32 4294967295, %s4703_s27   ;;  %s4703_s27 = sphi %s4825_s27, %s5716_s27   ;;  %s4699_s26 = sphi %s4823_s26, %s5718_s26   ;;  %s4695_s25 = sphi %s4821_s25, %s5720_s25   ;;  %s4691_s2 = sphi %s4819_s2, %s5719_s2  }
   0xd   : > { %5698 = sst [smem:[#allocation6_spill]] %s4699_s26  ;;  %s3573_s28 = sadd.s32 4294967294, %s4703_s27  }
   0xe   : > { %5699 = sst [smem:[#allocation7_spill]] %s4703_s27  ;;  %s4844_s29 = sadd.s32 1, %s4703_s27  }
   0xf   : > { %5700 = sst [smem:[#allocation8_spill]] %s4844_s29  ;;  %s487_s0 = sadd.s32 1, %s4699_s26 }
  0x10   : > { %s484_s4 = ssub.s32 %s4703_s27, %s4844_s29  ;;  %p497_p0 = scmp.ne.s32.totalorder %s4699_s26, %s4695_s25 }
  0x11   : > { %p485_p1 = scmp.eq.s32.totalorder %s484_s4, 0  ;;  %p498_p2 = scmp.eq.s32.totalorder %s4840_s3, 1 }
  0x12   : > { %p503_p3 = scmp.ne.s32.totalorder %s4695_s25, %s4691_s2  ;;  %p504_p4 = scmp.eq.s32.totalorder %s3573_s28, 1 }
  0x13   : > { %s4855_s30 = scalar_select %p485_p1, %s4699_s26, %s487_s0  }
  0x14   : > { %p4857_p5 = por %p498_p2, %p497_p0  ;;  %p4861_p6 = por %p504_p4, %p503_p3 }
  0x15   : > { %5701 = sst [smem:[#allocation9_spill]] %s4855_s30  ;;  %p3576_p7 = scmp.ge.s32.totalorder %s4703_s27, 1 }
  0x16   : > { %s5703_s22 = scalar_select %p4861_p6, 1, 0 }
  0x17   : > { %p590_p8 = scmp.lt.s32.totalorder %s4703_s27, 3 }
  0x18   : > { %5704 = sst [smem:[#allocation10_spill]] %s5703_s22 }
  0x19   : > { %p591_p9 = pnand %p3576_p7, %p590_p8 }
  0x1a   : > { %s5705_s24 = sld [smem:[#allocation12_spill]] (!%p591_p9)  ;;  %p650_p10 = scmp.lt.s32.totalorder (!%p591_p9), %s4840_s3, 1 }
  0x1b   : > { %594 = sbr.rel (%p591_p9) target bundleno = 5565 (0x15bd), region = 104  ;;  %s5706_s22 = sld [smem:[#allocation11_spill]] (!%p591_p9) }
  0x1c   : > { %s5709_s28 = sld [smem:[#allocation15_spill]] (!%p591_p9)  ;;  %s3939_s26 = sshll.u32 (!%p591_p9), %s4840_s3, 6 }
  0x1d   : > { %s5710_s1 = sld [smem:[#allocation16_spill]] (!%p591_p9) }
  0x1e   : > { %s5711_s6 = sld [smem:[#allocation17_spill]] (!%p591_p9) }
  0x1f   : > { %s5712_s30 = sld [smem:[#allocation18_spill]] (!%p591_p9) }
  0x20   : > { %v4455_v0 = vld [vmem:[%s5705_s24 + $0x38] sm:$0xff]   ;;  %v4705_v1 = vmov 0   ;;  %v4456_v2 = vld [vmem:[%s5705_s24 + $0x30] sm:$0xff]   ;;  %s651_s4 = scalar_select %p650_p10, %s4840_s3, 1  ;;  %v4457_v3 = vld [vmem:[%s5705_s24 + $0x28] sm:$0xff]   ;;  %vm760_vm0 = vcmask 523264  }
  0x21   : > { %764 = vmatprep.subr.bf16.mxu0 %v4705_v1  ;;  %v4458_v4 = vld [vmem:[%s5705_s24 + $0x20] sm:$0xff]   ;;  %v4459_v5 = vld [vmem:[%s5705_s24 + $0x18] sm:$0xff]   ;;  %v4460_v8 = vld [vmem:[%s5705_s24 + $0x10] sm:$0xff]   ;;  %vm806_vm1 = vcmask 1044480   ;;  %v4706_v40 = vmov 0.0   ;;  %vm4707_vm2 = vmmov 0  }
  0x22   : > { %765 = vmatpush1.bf16.msra.mxu0 %v4455_v0  ;;  %s3942_s23 = sshll.u32 %s651_s4, 3  ;;  %v4461_v9 = vld [vmem:[%s5705_s24 + $0x8] sm:$0xff]   ;;  %v4462_v10 = vld [vmem:[%s5705_s24] sm:$0xff]   ;;  %v4463_v11 = vld [vmem:[%s5705_s24 + $0x58] sm:$0xff]   ;;  %s5708_s4 = sld [smem:[#allocation14_spill]]  ;;  %4101 = vmatprep.subr.bf16.mxu1 %v4706_v40  ;;  %vm1199_vm3 = vcmask 261120  }
  0x23   : > { %766 = vmatprep.subr.bf16.mxu0 %v4705_v1  ;;  %s654_s2 = scalar_lea.vmem %s5706_s22, %s3942_s23  ;;  %v4464_v12 = vld [vmem:[%s5705_s24 + $0x50] sm:$0xff]   ;;  %v4465_v13 = vld [vmem:[%s5705_s24 + $0x48] sm:$0xff]   ;;  %v4466_v14 = vld [vmem:[%s5705_s24 + $0x40] sm:$0xff]   ;;  %4117 = vmatprep.mubr.msk.bf16.mxu1 %vm4707_vm2, %v4706_v40  ;;  %vm1276_vm4 = vcmask 36864   ;;  %vm1288_vm5 = vcmask 39936   ;;  %s647_s23 = sand.u32 1, %s4695_s25  }
  0x24   : > { %v656_v6 = vld [vmem:[%s654_s2] sm:$0x77]  ;;  %s5707_s2 = sld [smem:[#allocation13_spill]]  ;;  %v4469_v38 = vld [vmem:[%s5666_s7 + $0x38] sm:$0xff]   ;;  %v4471_v41 = vld [vmem:[%s5666_s7 + $0x30] sm:$0xff]  }
  0x25   : > { %v3581_v7 = vcombine.high %v656_v6, %v656_v6  ;;  %v3580_v15 = vcombine.low %v656_v6, %v656_v6  ;;  %v3596_v34 = vld [vmem:[%s5709_s28] ss:$0 sm:$0xff]  ;;  %v4470_v39 = vld [vmem:[%s5670_s11 + $0x38] sm:$0xff]   ;;  %4102 = vmatpush3.bf16.msra.mxu1 %v4469_v38  ;;  %v4472_v42 = vld [vmem:[%s5670_s11 + $0x30] sm:$0xff]   ;;  %s3512_s22 = scalar_lea.hbm %s5712_s30, %s3939_s26  ;;  %s4708_s28 = smov [#allocation2]  }
  0x26   : > { %767 = vmatpush1.bf16.msra.mxu0 %v4456_v2  ;;  %4103 = vmatprep.subr.bf16.mxu1 %v4706_v40  ;;  %v4473_v48 = vld [vmem:[%s5666_s7 + $0x28] sm:$0xff]   ;;  %v4475_v50 = vld [vmem:[%s5666_s7 + $0x20] sm:$0xff]   ;;  %v4477_v52 = vld [vmem:[%s5666_s7 + $0x18] sm:$0xff]   ;;  %s4647_s3 = sshll.u32 %s4708_s28, 4  ;;  %s4648_s3 = int_to_ptr.vmem [resolvable:$false] %s4647_s3 }
  0x27   : > { %768 = vmatprep.subr.bf16.mxu0 %v4705_v1  ;;  %3594 = vmatprep.mubr.msk.bf16.mxu0 %vm760_vm0, %v3581_v7  ;;  %v4474_v49 = vld [vmem:[%s5670_s11 + $0x28] sm:$0xff]   ;;  %v4476_v51 = vld [vmem:[%s5670_s11 + $0x20] sm:$0xff]   ;;  %v4478_v53 = vld [vmem:[%s5670_s11 + $0x18] sm:$0xff]  }
  0x28   : > { %v3595_v32 = vld [vmem:[%s5708_s4] ss:$0 sm:$0xff]  ;;  %v4479_v54 = vld [vmem:[%s5666_s7 + $0x10] sm:$0xff]   ;;  %v4481_v56 = vld [vmem:[%s5666_s7 + $0x8] sm:$0xff]   ;;  %s3501_s4 = scalar_lea.sflag [#allocation3], %s647_s23 }
  0x29   : > { %4104 = vmatpush3.bf16.msra.mxu1 %v4471_v41  ;;  %v4480_v55 = vld [vmem:[%s5670_s11 + $0x10] sm:$0xff]   ;;  %v4482_v57 = vld [vmem:[%s5670_s11 + $0x8] sm:$0xff]   ;;  %v4483_v58 = vld [vmem:[%s5666_s7] sm:$0xff]  }
  0x2a   : > { %769 = vmatpush1.bf16.msra.mxu0 %v4457_v3  ;;  %v681_v16 = vld [vmem:[%s5707_s2] sm:$0x1f]  ;;  %4105 = vmatprep.subr.bf16.mxu1 %v4706_v40  ;;  %v4485_v6 = vld [vmem:[%s5668_s9 + $0x38] sm:$0xff]   ;;  %v4515_v38 = vld [vmem:[%s5668_s9 + $0x88] sm:$0xff]  }
  0x2b   : > { %770 = vmatprep.subr.bf16.mxu0 %v4705_v1  ;;  %v4484_v59 = vld [vmem:[%s5670_s11] sm:$0xff]   ;;  %v4486_v7 = vld [vmem:[%s5666_s7 + $0x78] sm:$0xff]  }
  0x2c   : > { %v3597_v0 = vld [vmem:[%s5710_s1] ss:$0 sm:$0xff]  ;;  %s3577_s1 = sshll.u32 %s647_s23, 2 }
  0x2d   : > { %4106 = vmatpush3.bf16.msra.mxu1 %v4473_v48  ;;  %v3598_v3 = vld [vmem:[%s5711_s6] ss:$0 sm:$0xff]  ;;  %s649_s29 = scalar_lea.vmem [#allocation2], %s3577_s1  ;;  %s4649_s1 = scalar_lea.vmem %s4648_s3, 128 }
  0x2e   : > { %771 = vmatpush1.bf16.msra.mxu0 %v4458_v4  ;;  %4107 = vmatprep.subr.bf16.mxu1 %v4706_v40  ;;  %s3514_s21 = sshll.u32 %s649_s29, 4  ;;  %s3515_s21 = int_to_ptr.vmem [resolvable:$true] %s3514_s21 }
  0x2f   : > { %772 = vmatprep.subr.bf16.mxu0 %v4705_v1  ;;  %s4643_s6 = scalar_lea.vmem %s3515_s21, 64  ;;  %p4650_p0 = scmp.lt.s32.totalorder %s3515_s21, %s4648_s3 }
  0x30   : > { %p4644_p11 = scmp.ne.s32.totalorder %s3515_s21, %s4643_s6  ;;  %p4651_p1 = scmp.lt.s32.totalorder %s4649_s1, %s4643_s6 }
  0x31   : > { %4108 = vmatpush3.bf16.msra.mxu1 %v4475_v50 }
  0x32   : > { %773 = vmatpush1.bf16.msra.mxu0 %v4459_v5  ;;  %4109 = vmatprep.subr.bf16.mxu1 %v4706_v40  ;;  %p4645_p12 = pnand %p4644_p11, %p4857_p5  ;;  %p4652_p2 = por %p4651_p1, %p4650_p0 }
  0x33   : > { %774 = vmatprep.subr.bf16.mxu0 %v4705_v1 }
  0x34   : > { %p4646_p13 = pneg %p4645_p12 }
  0x35   : > { %4110 = vmatpush3.bf16.msra.mxu1 %v4477_v52  ;;  %v3599_v52 = vld [vmem:[%s5667_s8] ss:$0 sm:$0xff] }
  0x36   : > { %775 = vmatpush1.bf16.msra.mxu0 %v4460_v8  ;;  %4111 = vmatprep.subr.bf16.mxu1 %v4706_v40  ;;  %p4653_p3 = pnand %p4652_p2, %p4646_p13 }
  0x37   : > { %776 = vmatprep.subr.bf16.mxu0 %v4705_v1 }
  0x39   : > { %4112 = vmatpush3.bf16.msra.mxu1 %v4479_v54  ;;  %v3617_v54 = vld [vmem:[%s5671_s12] ss:$0 sm:$0xff] }
  0x3a   : > { %777 = vmatpush1.bf16.msra.mxu0 %v4461_v9  ;;  %4113 = vmatprep.subr.bf16.mxu1 %v4706_v40  ;;  %v4487_v9 = vld [vmem:[%s5668_s9 + $0x30] sm:$0xff]  }
  0x3b   : > { %778 = vmatprep.subr.bf16.mxu0 %v4705_v1 }
  0x3d   : > { %4114 = vmatpush3.bf16.msra.mxu1 %v4481_v56 }
  0x3e   : > { %779 = vmatpush1.bf16.msra.mxu0 %v4462_v10  ;;  %4115 = vmatprep.subr.bf16.mxu1 %v4706_v40  ;;  %v4488_v10 = vld [vmem:[%s5666_s7 + $0x70] sm:$0xff]  }
  0x3f   : > { %788 = vmatprep.subr.bf16.mxu0 %v4705_v1 }
  0x41   : > { %4116 = vmatpush3.bf16.msra.mxu1 %v4483_v58 }
  0x42   : > { %789 = vmatpush2.bf16.msra.mxu0 %v4463_v11  ;;  %4121 = vmatprep.subr.bf16.mxu1 %v4706_v40  ;;  %v4489_v11 = vld [vmem:[%s5668_s9 + $0x28] sm:$0xff]  }
  0x43   : > { %790 = vmatprep.subr.bf16.mxu0 %v4705_v1 }
  0x46   : > { %791 = vmatpush2.bf16.msra.mxu0 %v4464_v12  ;;  %v4490_v12 = vld [vmem:[%s5666_s7 + $0x68] sm:$0xff]  }
  0x47   : > { %792 = vmatprep.subr.bf16.mxu0 %v4705_v1 }
  0x4a   : > { %793 = vmatpush2.bf16.msra.mxu0 %v4465_v13  ;;  %v4491_v13 = vld [vmem:[%s5668_s9 + $0x20] sm:$0xff]  }
  0x4b   : > { %794 = vmatprep.subr.bf16.mxu0 %v4705_v1 }
  0x4e   : > { %795 = vmatpush2.bf16.msra.mxu0 %v4466_v14  ;;  %v4492_v14 = vld [vmem:[%s5666_s7 + $0x60] sm:$0xff]  }
  0x4f   : > { %4141 = vmatprep.subr.bf16.mxu0 %v4706_v40 }
  0x51   : > { %797 = vmatmul.mubr.bf16.vlgmr.msra.gmra.mxu0 %v3580_v15  ;;  %v4493_v15 = vld [vmem:[%s5668_s9 + $0x18] sm:$0xff]  }
  0x52   : > { %4142 = vmatpush3.bf16.msra.mxu0 %v4470_v39  ;;  %4157 = vmatprep.mubr.msk.bf16.mxu0 %vm4707_vm2, %v4706_v40  ;;  %v4516_v39 = vld [vmem:[%s5668_s9 + $0x80] sm:$0xff]  }
  0x53   : > { %4143 = vmatprep.subr.bf16.mxu0 %v4706_v40 }
  0x56   : > { %4144 = vmatpush3.bf16.msra.mxu0 %v4472_v42 }
  0x57   : > { %4145 = vmatprep.subr.bf16.mxu0 %v4706_v40 }
  0x5a   : > { %4146 = vmatpush3.bf16.msra.mxu0 %v4474_v49  ;;  %v3608_v49 = vld [vmem:[%s5669_s10] ss:$0 sm:$0xff] }
  0x5b   : > { %4147 = vmatprep.subr.bf16.mxu0 %v4706_v40 }
  0x5e   : > { %4148 = vmatpush3.bf16.msra.mxu0 %v4476_v51 }
  0x5f   : > { %4149 = vmatprep.subr.bf16.mxu0 %v4706_v40 }
  0x62   : > { %4150 = vmatpush3.bf16.msra.mxu0 %v4478_v53 }
  0x63   : > { %4151 = vmatprep.subr.bf16.mxu0 %v4706_v40 }
  0x66   : > { %4152 = vmatpush3.bf16.msra.mxu0 %v4480_v55 }
  0x67   : > { %4153 = vmatprep.subr.bf16.mxu0 %v4706_v40 }
  0x6a   : > { %4154 = vmatpush3.bf16.msra.mxu0 %v4482_v57 }
  0x6b   : > { %4155 = vmatprep.subr.bf16.mxu0 %v4706_v40 }
  0x6e   : > { %4156 = vmatpush3.bf16.msra.mxu0 %v4484_v59 }
  0x6f   : > { %4179 = vmatprep.subr.bf16.mxu0 %v4706_v40 }
 0x111   : > { %v798_v17 = vpop.f32.mrf.mxu0 }
 0x112   : > { %v799_v18 = vadd.f32 %v798_v17, %v681_v16  ;;  %v4494_v16 = vld [vmem:[%s5666_s7 + $0x58] sm:$0xff]   ;;  %v4495_v17 = vld [vmem:[%s5668_s9 + $0x10] sm:$0xff]  }
 0x113   : > { %v800_v19 = vpop.f32.mrf.mxu0 }
 0x114   : > { %v807_v20 = vsel %vm806_vm1, %v799_v18, 0.0  ;;  %v4497_v19 = vld [vmem:[%s5668_s9 + $0x8] sm:$0xff]  }
 0x115   : > { %v801_v21 = vpop.f32.mrf.mxu0  ;;  %808 = vadd.xlane.f32.xlu0 %v807_v20  ;;  %v4498_v20 = vld [vmem:[%s5666_s7 + $0x48] sm:$0xff]  }
 0x116   : > { %v4499_v21 = vld [vmem:[%s5668_s9] sm:$0xff]  }
 0x117   : > { %v802_v22 = vpop.f32.mrf.mxu0 }
 0x118   : > { %v4500_v22 = vld [vmem:[%s5666_s7 + $0x40] sm:$0xff]  }
 0x19e   : > { %v809_v23 = vpop.xlane.xlu0 %808 }
 0x19f   : > { %v811_v24 = vmul.f32 0.0078125, %v809_v23  ;;  %v4501_v23 = vld [vmem:[%s5670_s11 + $0x78] sm:$0xff]  }
 0x1a1   : > { %v812_v25 = vsub.f32 %v799_v18, %v811_v24  ;;  %v4496_v18 = vld [vmem:[%s5666_s7 + $0x50] sm:$0xff]  }
 0x1a2   : > { %v4502_v24 = vld [vmem:[%s5670_s11 + $0x70] sm:$0xff]  }
 0x1a3   : > { %v813_v26 = vmul.f32 %v812_v25, %v812_v25 }
 0x1a5   : > { %v814_v27 = vsel %vm806_vm1, %v813_v26, 0.0  ;;  %v4504_v26 = vld [vmem:[%s5670_s11 + $0x60] sm:$0xff]  }
 0x1a6   : > { %815 = vadd.xlane.f32.xlu0 %v814_v27  ;;  %v4505_v27 = vld [vmem:[%s5670_s11 + $0x58] sm:$0xff]  }
 0x22f   : > { %v816_v28 = vpop.xlane.xlu0 %815 }
 0x230   : > { %v817_v29 = vmul.f32 0.0078125, %v816_v28  ;;  %v4506_v28 = vld [vmem:[%s5670_s11 + $0x50] sm:$0xff]  }
 0x232   : > { %v818_v30 = vadd.f32 1e-05, %v817_v29  ;;  %v4507_v29 = vld [vmem:[%s5670_s11 + $0x48] sm:$0xff]  }
 0x234   : > { %4613 = vrsqrt.f32 %v818_v30  ;;  %v4508_v30 = vld [vmem:[%s5670_s11 + $0x40] sm:$0xff]  }
 0x241   : > { %v4614_v31 = vpop.eup %4613 }
 0x242   : > { %v820_v33 = vmul.f32 %v4614_v31, %v812_v25  ;;  %v4503_v25 = vld [vmem:[%s5670_s11 + $0x68] sm:$0xff]   ;;  %v4509_v31 = vld [vmem:[%s5668_s9 + $0xb8] sm:$0xff]  }
 0x244   : > { %v827_v35 = vmul.f32 %v3595_v32, %v820_v33  ;;  %v4510_v32 = vld [vmem:[%s5668_s9 + $0xb0] sm:$0xff]   ;;  %v4511_v33 = vld [vmem:[%s5668_s9 + $0xa8] sm:$0xff]  }
 0x246   : > { %v4931_v36 = vadd.f32 %v3596_v34, %v827_v35  ;;  %v4512_v34 = vld [vmem:[%s5668_s9 + $0xa0] sm:$0xff]   ;;  %v4513_v35 = vld [vmem:[%s5668_s9 + $0x98] sm:$0xff]  }
 0x248   : > { %v837_v37 = vsel %vm806_vm1, %v4931_v36, 0.0 }
 0x249   : > { %838 = vadd.xlane.f32.xlu1 %v837_v37  ;;  %v4514_v37 = vld [vmem:[%s5668_s9 + $0x90] sm:$0xff]  }
 0x2d2   : > { %v839_v43 = vpop.xlane.xlu1 %838 }
 0x2d3   : > { %v840_v44 = vmul.f32 0.0078125, %v839_v43 }
 0x2d5   : > { %v841_v45 = vsub.f32 %v4931_v36, %v840_v44 }
 0x2d7   : > { %v842_v46 = vmul.f32 %v841_v45, %v841_v45 }
 0x2d9   : > { %v843_v47 = vsel %vm806_vm1, %v842_v46, 0.0 }
 0x2da   : > { %844 = vadd.xlane.f32.xlu1 %v843_v47 }
 0x363   : > { %v845_v60 = vpop.xlane.xlu1 %844 }
 0x364   : > { %v846_v61 = vmul.f32 0.0078125, %v845_v60 }
 0x366   : > { %v847_v62 = vadd.f32 1e-05, %v846_v61 }
 0x368   : > { %4615 = vrsqrt.f32 %v847_v62 }
 0x375   : > { %v4616_v63 = vpop.eup %4615 }
 0x376   : > { %v849_v2 = vmul.f32 %v4616_v63, %v841_v45 }
 0x378   : > { %v856_v4 = vmul.f32 %v3597_v0, %v849_v2 }
 0x37a   : > { %v863_v5 = vadd.f32 %v3598_v3, %v856_v4  ;;  %v3766_v4 = vld [vmem:[%s5669_s10 + $0x2] ss:$0 sm:$0xff] }
 0x37c   : > { %v5019_v8 = vpack.c.bf16 %v863_v5, %v863_v5 }
 0x37e   : > { %4118 = vmatmul.mubr.bf16.vlgmr.msra.gmra.mxu1 %v5019_v8  ;;  %4158 = vmatmul.mubr.bf16.vlgmr.msra.gmra.mxu0 %v5019_v8 }
 0x37f   : > { %4122 = vmatpush3.bf16.msra.mxu1 %v4485_v6  ;;  %4180 = vmatpush3.bf16.msra.mxu0 %v4486_v7 }
 0x380   : > { %4123 = vmatprep.subr.bf16.mxu1 %v4706_v40  ;;  %4181 = vmatprep.subr.bf16.mxu0 %v4706_v40 }
 0x381   : > { %4137 = vmatprep.mubr.msk.bf16.mxu1 %vm4707_vm2, %v4706_v40  ;;  %4195 = vmatprep.mubr.msk.bf16.mxu0 %vm4707_vm2, %v4706_v40 }
 0x383   : > { %4124 = vmatpush3.bf16.msra.mxu1 %v4487_v9  ;;  %4182 = vmatpush3.bf16.msra.mxu0 %v4488_v10 }
 0x384   : > { %4125 = vmatprep.subr.bf16.mxu1 %v4706_v40  ;;  %4183 = vmatprep.subr.bf16.mxu0 %v4706_v40 }
 0x387   : > { %4126 = vmatpush3.bf16.msra.mxu1 %v4489_v11  ;;  %4184 = vmatpush3.bf16.msra.mxu0 %v4490_v12 }
 0x388   : > { %4127 = vmatprep.subr.bf16.mxu1 %v4706_v40  ;;  %4185 = vmatprep.subr.bf16.mxu0 %v4706_v40 }
 0x38b   : > { %4128 = vmatpush3.bf16.msra.mxu1 %v4491_v13  ;;  %4186 = vmatpush3.bf16.msra.mxu0 %v4492_v14 }
 0x38c   : > { %4129 = vmatprep.subr.bf16.mxu1 %v4706_v40  ;;  %4187 = vmatprep.subr.bf16.mxu0 %v4706_v40 }
 0x38f   : > { %4130 = vmatpush3.bf16.msra.mxu1 %v4493_v15  ;;  %4188 = vmatpush3.bf16.msra.mxu0 %v4494_v16 }
 0x390   : > { %4131 = vmatprep.subr.bf16.mxu1 %v4706_v40  ;;  %4189 = vmatprep.subr.bf16.mxu0 %v4706_v40 }
 0x393   : > { %4132 = vmatpush3.bf16.msra.mxu1 %v4495_v17  ;;  %4190 = vmatpush3.bf16.msra.mxu0 %v4496_v18 }
 0x394   : > { %4133 = vmatprep.subr.bf16.mxu1 %v4706_v40  ;;  %4191 = vmatprep.subr.bf16.mxu0 %v4706_v40 }
 0x397   : > { %4134 = vmatpush3.bf16.msra.mxu1 %v4497_v19  ;;  %4192 = vmatpush3.bf16.msra.mxu0 %v4498_v20 }
 0x398   : > { %4135 = vmatprep.subr.bf16.mxu1 %v4706_v40  ;;  %4193 = vmatprep.subr.bf16.mxu0 %v4706_v40 }
 0x39b   : > { %4136 = vmatpush3.bf16.msra.mxu1 %v4499_v21  ;;  %4194 = vmatpush3.bf16.msra.mxu0 %v4500_v22  ;;  %v4517_v21 = vld [vmem:[%s5672_s13 + $0x8] sm:$0xff]  }
 0x39c   : > { %4219 = vmatprep.subr.bf16.mxu0 %v4706_v40  ;;  %4161 = vmatprep.subr.mxu1 %v4706_v40 }
 0x39e   : > { %4138 = vmatmul.mubr.bf16.vlgmr.msra.gmra.mxu1 %v5019_v8  ;;  %4196 = vmatmul.mubr.bf16.vlgmr.msra.gmra.mxu0 %v5019_v8 }
 0x39f   : > { %4220 = vmatpush3.bf16.msra.mxu0 %v4501_v23  ;;  %4235 = vmatprep.mubr.msk.bf16.mxu0 %vm4707_vm2, %v4706_v40  ;;  %v4518_v23 = vld [vmem:[%s5672_s13] sm:$0xff]  }
 0x3a0   : > { %4221 = vmatprep.subr.bf16.mxu0 %v4706_v40  ;;  %4163 = vmatprep.mubr.msk.f32.mxu1 %vm4707_vm2, %v4706_v40 }
 0x3a3   : > { %4222 = vmatpush3.bf16.msra.mxu0 %v4502_v24 }
 0x3a4   : > { %4223 = vmatprep.subr.bf16.mxu0 %v4706_v40 }
 0x3a7   : > { %4224 = vmatpush3.bf16.msra.mxu0 %v4503_v25  ;;  %v4519_v25 = vld [vmem:[%s5668_s9 + $0x78] sm:$0xff]  }
 0x3a8   : > { %4225 = vmatprep.subr.bf16.mxu0 %v4706_v40 }
 0x3ab   : > { %4226 = vmatpush3.bf16.msra.mxu0 %v4504_v26 }
 0x3ac   : > { %4227 = vmatprep.subr.bf16.mxu0 %v4706_v40 }
 0x3af   : > { %4228 = vmatpush3.bf16.msra.mxu0 %v4505_v27 }
 0x3b0   : > { %4229 = vmatprep.subr.bf16.mxu0 %v4706_v40 }
 0x3b3   : > { %4230 = vmatpush3.bf16.msra.mxu0 %v4506_v28  ;;  %v4520_v28 = vld [vmem:[%s5668_s9 + $0x70] sm:$0xff]  }
 0x3b4   : > { %4231 = vmatprep.subr.bf16.mxu0 %v4706_v40 }
 0x3b7   : > { %4232 = vmatpush3.bf16.msra.mxu0 %v4507_v29  ;;  %v4521_v29 = vld [vmem:[%s5668_s9 + $0x68] sm:$0xff]  }
 0x3b8   : > { %4233 = vmatprep.subr.bf16.mxu0 %v4706_v40 }
 0x3bb   : > { %4234 = vmatpush3.bf16.msra.mxu0 %v4508_v30  ;;  %v4522_v30 = vld [vmem:[%s5668_s9 + $0x60] sm:$0xff]  }
 0x3bc   : > { %4277 = vmatprep.subr.bf16.mxu0 %v4706_v40 }
 0x3be   : > { %4236 = vmatmul.mubr.bf16.vlgmr.msra.gmra.mxu0 %v5019_v8 }
 0x3bf   : > { %4278 = vmatpush3.bf16.msra.mxu0 %v4509_v31  ;;  %4293 = vmatprep.mubr.msk.bf16.mxu0 %vm4707_vm2, %v4706_v40  ;;  %v4523_v31 = vld [vmem:[%s5668_s9 + $0x58] sm:$0xff]  }
 0x3c0   : > { %4279 = vmatprep.subr.bf16.mxu0 %v4706_v40 }
 0x3c3   : > { %4280 = vmatpush3.bf16.msra.mxu0 %v4510_v32  ;;  %v4524_v32 = vld [vmem:[%s5668_s9 + $0x50] sm:$0xff]  }
 0x3c4   : > { %4281 = vmatprep.subr.bf16.mxu0 %v4706_v40 }
 0x3c7   : > { %4282 = vmatpush3.bf16.msra.mxu0 %v4511_v33  ;;  %v4525_v33 = vld [vmem:[%s5668_s9 + $0x48] sm:$0xff]  }
 0x3c8   : > { %4283 = vmatprep.subr.bf16.mxu0 %v4706_v40 }
 0x3cb   : > { %4284 = vmatpush3.bf16.msra.mxu0 %v4512_v34  ;;  %v4526_v34 = vld [vmem:[%s5668_s9 + $0x40] sm:$0xff]  }
 0x3cc   : > { %4285 = vmatprep.subr.bf16.mxu0 %v4706_v40 }
 0x3cf   : > { %4286 = vmatpush3.bf16.msra.mxu0 %v4513_v35 }
 0x3d0   : > { %4287 = vmatprep.subr.bf16.mxu0 %v4706_v40 }
 0x3d3   : > { %4288 = vmatpush3.bf16.msra.mxu0 %v4514_v37 }
 0x3d4   : > { %4289 = vmatprep.subr.bf16.mxu0 %v4706_v40 }
 0x3d7   : > { %4290 = vmatpush3.bf16.msra.mxu0 %v4515_v38 }
 0x3d8   : > { %4291 = vmatprep.subr.bf16.mxu0 %v4706_v40 }
 0x3db   : > { %4292 = vmatpush3.bf16.msra.mxu0 %v4516_v39 }
 0x3dc   : > { %4317 = vmatprep.subr.mxu0 %v4706_v40 }
 0x3de   : > { %4294 = vmatmul.mubr.bf16.vlgmr.msra.gmra.mxu0 %v5019_v8 }
 0x3df   : > { %4319 = vmatprep.mubr.msk.f32.mxu0 %vm4707_vm2, %v4706_v40 }
 0x43e   : > { %v971_v41 = vpop.f32.mrf.mxu1  ;;  %v1193_v42 = vpop.f32.mrf.mxu0 }
 0x43f   : > { %v972_v57 = vadd.f32 %v3599_v52, %v971_v41  ;;  %v1194_v60 = vadd.f32 %v3617_v54, %v1193_v42  ;;  %v3677_v41 = vld [vmem:[%s5669_s10 + $0x1] ss:$0 sm:$0xff] }
 0x440   : > { %v4119_v43 = vpop.f32.mrf.mxu1  ;;  %v4159_v44 = vpop.f32.mrf.mxu0 }
 0x441   : > { %v3651_v43 = vld [vmem:[%s5667_s8 + $0x1] ss:$0 sm:$0xff] }
 0x442   : > { %v974_v45 = vpop.f32.mrf.mxu1  ;;  %v1196_v46 = vpop.f32.mrf.mxu0 }
 0x443   : > { %v3703_v45 = vld [vmem:[%s5671_s12 + $0x1] ss:$0 sm:$0xff] }
 0x444   : > { %v4120_v47 = vpop.f32.mrf.mxu1  ;;  %v4160_v48 = vpop.f32.mrf.mxu0 }
 0x45e   : > { %v1082_v50 = vpop.f32.mrf.mxu1  ;;  %v5164_v51 = vpop.f32.mrf.mxu0 }
 0x45f   : > { %v1083_v53 = vadd.f32 %v3608_v49, %v1082_v50  ;;  %v1540_v47 = vadd.f32 %v3651_v43, %v5164_v51 }
 0x460   : > { %v4139_v55 = vpop.f32.mrf.mxu1  ;;  %v4197_v56 = vpop.f32.mrf.mxu0 }
 0x461   : > { %4162 = vmatpush3.xpose.msk.msra.mxu1 %vm1199_vm3, %v1083_v53 }
 0x462   : > { %v1085_v58 = vpop.f32.mrf.mxu1  ;;  %v1542_v59 = vpop.f32.mrf.mxu0  ;;  %4166 = vmatprep.subr.mxu1 %v4706_v40 }
 0x464   : > { %v4140_v61 = vpop.f32.mrf.mxu1  ;;  %4164 = vmatmul.mubr.msk.f32.vlgmr.msra.gmra.mxu1 %vm1199_vm3, %v972_v57  ;;  %v4198_v62 = vpop.f32.mrf.mxu0 }
 0x465   : > { %4167 = vmatpush3.msk.msra.mxu1 %vm806_vm1, %v1194_v60  ;;  %4168 = vmatprep.mubr.msk.f32.mxu1 %vm4707_vm2, %v4706_v40  ;;  %v4527_v61 = vld [vmem:[%s5672_s13 + $0x18] sm:$0xff]  }
 0x466   : > { %4171 = vmatprep.subr.bf16.mxu1 %v4706_v40 }
 0x47e   : > { %v5179_v63 = vpop.f32.mrf.mxu0 }
 0x47f   : > { %v1766_v49 = vadd.f32 %v3703_v45, %v5179_v63  ;;  %v4528_v63 = vld [vmem:[%s5672_s13 + $0x10] sm:$0xff]  }
 0x480   : > { %v4237_v0 = vpop.f32.mrf.mxu0 }
 0x482   : > { %v1768_v2 = vpop.f32.mrf.mxu0 }
 0x483   : > { %v4529_v2 = vld [vmem:[%s5666_s7 + $0xb8] sm:$0xff]  }
 0x484   : > { %v4238_v3 = vpop.f32.mrf.mxu0 }
 0x49e   : > { %v2216_v5 = vpop.f32.mrf.mxu0 }
 0x49f   : > { %v2217_v6 = vadd.f32 %v3766_v4, %v2216_v5  ;;  %v4530_v5 = vld [vmem:[%s5666_s7 + $0xb0] sm:$0xff]  }
 0x4a0   : > { %v4295_v7 = vpop.f32.mrf.mxu0 }
 0x4a1   : > { %4318 = vmatpush3.xpose.msk.msra.mxu0 %vm1199_vm3, %v2217_v6  ;;  %v4531_v6 = vld [vmem:[%s5666_s7 + $0xa8] sm:$0xff]   ;;  %v4532_v7 = vld [vmem:[%s5666_s7 + $0xa0] sm:$0xff]  }
 0x4a2   : > { %v2219_v9 = vpop.f32.mrf.mxu0  ;;  %4322 = vmatprep.subr.mxu0 %v4706_v40 }
 0x4a3   : > { %v4533_v9 = vld [vmem:[%s5666_s7 + $0x98] sm:$0xff]  }
 0x4a4   : > { %v4296_v10 = vpop.f32.mrf.mxu0 }
 0x4a5   : > { %v4534_v10 = vld [vmem:[%s5666_s7 + $0x90] sm:$0xff]  }
 0x524   : > { %v1272_v11 = vpop.f32.mrf.mxu1 }
 0x525   : > { %v1277_v12 = vsel %vm1276_vm4, %v1272_v11, -inf }
 0x526   : > { %1278 = vmax.xlane.f32.xlu0 %v1277_v12  ;;  %v4165_v13 = vpop.f32.mrf.mxu1  ;;  %v4536_v12 = vld [vmem:[%s5666_s7 + $0x80] sm:$0xff]  }
 0x527   : > { %v4537_v13 = vld [vmem:[%s5670_s11 + $0xb8] sm:$0xff]  }
 0x5af   : > { %v1279_v14 = vpop.xlane.xlu0 %1278 }
 0x5b0   : > { %v1280_v15 = vsub.f32 %v1272_v11, %v1279_v14  ;;  %v4535_v11 = vld [vmem:[%s5666_s7 + $0x88] sm:$0xff]   ;;  %v4538_v14 = vld [vmem:[%s5670_s11 + $0xb0] sm:$0xff]  }
 0x5b2   : > { %v1281_v16 = vmul.f32 1.442695, %v1280_v15  ;;  %v4539_v15 = vld [vmem:[%s5670_s11 + $0xa8] sm:$0xff]  }
 0x5b4   : > { %4617 = vpow2.f32 %v1281_v16  ;;  %v4540_v16 = vld [vmem:[%s5670_s11 + $0xa0] sm:$0xff]  }
 0x5c1   : > { %v4618_v17 = vpop.eup %4617 }
 0x5c2   : > { %v1283_v18 = vsel %vm1276_vm4, %v4618_v17, 0.0 }
 0x5c3   : > { %1284 = vadd.xlane.f32.xlu1 %v1283_v18  ;;  %v4542_v18 = vld [vmem:[%s5670_s11 + $0x90] sm:$0xff]  }
 0x64c   : > { %v1285_v19 = vpop.xlane.xlu1 %1284 }
 0x64d   : > { %4619 = vrcp.f32 %v1285_v19  ;;  %v4543_v19 = vld [vmem:[%s5670_s11 + $0x88] sm:$0xff]  }
 0x65a   : > { %v4620_v20 = vpop.eup %4619 }
 0x65b   : > { %v1287_v22 = vmul.f32 %v4620_v20, %v4618_v17  ;;  %v4541_v17 = vld [vmem:[%s5670_s11 + $0x98] sm:$0xff]   ;;  %v4544_v20 = vld [vmem:[%s5670_s11 + $0x80] sm:$0xff]  }
 0x65d   : > { %4169 = vmatmul.mubr.msk.f32.vlgmr.msra.gmra.mxu1 %vm1288_vm5, %v1287_v22  ;;  %v4546_v22 = vld [vmem:[%s5668_s9 + $0xf0] sm:$0xff]  }
 0x65e   : > { %4172 = vmatpush3.bf16.msra.mxu1 %v4517_v21  ;;  %4175 = vmatprep.mubr.msk.bf16.mxu1 %vm4707_vm2, %v4706_v40  ;;  %v4545_v21 = vld [vmem:[%s5668_s9 + $0xf8] sm:$0xff]  }
 0x65f   : > { %4173 = vmatprep.subr.bf16.mxu1 %v4706_v40 }
 0x662   : > { %4174 = vmatpush3.bf16.msra.mxu1 %v4518_v23  ;;  %v4547_v23 = vld [vmem:[%s5668_s9 + $0xe8] sm:$0xff]  }
 0x663   : > { %4199 = vmatprep.subr.bf16.mxu1 %v4706_v40 }
 0x71d   : > { %v1361_v24 = vpop.f32.mrf.mxu1 }
 0x71e   : > { %v1365_v26 = vpack.c.bf16 %v1361_v24, %v1361_v24  ;;  %v4548_v24 = vld [vmem:[%s5668_s9 + $0xe0] sm:$0xff]  }
 0x71f   : > { %v4170_v27 = vpop.f32.mrf.mxu1 }
 0x720   : > { %4176 = vmatmul.mubr.msk.bf16.vlgmr.msra.gmra.mxu1 %vm1199_vm3, %v1365_v26  ;;  %v4550_v26 = vld [vmem:[%s5668_s9 + $0xd0] sm:$0xff]   ;;  %v4551_v27 = vld [vmem:[%s5668_s9 + $0xc8] sm:$0xff]  }
 0x721   : > { %4200 = vmatpush3.bf16.msra.mxu1 %v4519_v25  ;;  %4215 = vmatprep.mubr.msk.bf16.mxu1 %vm4707_vm2, %v4706_v40  ;;  %v4549_v25 = vld [vmem:[%s5668_s9 + $0xd8] sm:$0xff]  }
 0x722   : > { %4201 = vmatprep.subr.bf16.mxu1 %v4706_v40 }
 0x725   : > { %4202 = vmatpush3.bf16.msra.mxu1 %v4520_v28  ;;  %v4552_v28 = vld [vmem:[%s5668_s9 + $0xc0] sm:$0xff]  }
 0x726   : > { %4203 = vmatprep.subr.bf16.mxu1 %v4706_v40 }
 0x729   : > { %4204 = vmatpush3.bf16.msra.mxu1 %v4521_v29  ;;  %v3633_v29 = vld [vmem:[%s5673_s14] ss:$0 sm:$0xff] }
 0x72a   : > { %4205 = vmatprep.subr.bf16.mxu1 %v4706_v40 }
 0x72d   : > { %4206 = vmatpush3.bf16.msra.mxu1 %v4522_v30 }
 0x72e   : > { %4207 = vmatprep.subr.bf16.mxu1 %v4706_v40 }
 0x731   : > { %4208 = vmatpush3.bf16.msra.mxu1 %v4523_v31 }
 0x732   : > { %4209 = vmatprep.subr.bf16.mxu1 %v4706_v40 }
 0x735   : > { %4210 = vmatpush3.bf16.msra.mxu1 %v4524_v32 }
 0x736   : > { %4211 = vmatprep.subr.bf16.mxu1 %v4706_v40 }
 0x739   : > { %4212 = vmatpush3.bf16.msra.mxu1 %v4525_v33 }
 0x73a   : > { %4213 = vmatprep.subr.bf16.mxu1 %v4706_v40 }
 0x73d   : > { %4214 = vmatpush3.bf16.msra.mxu1 %v4526_v34 }
 0x73e   : > { %4239 = vmatprep.subr.mxu1 %v4706_v40 }
 0x740   : > { %4216 = vmatmul.mubr.bf16.vlgmr.msra.gmra.mxu1 %v5019_v8 }
 0x741   : > { %4241 = vmatprep.mubr.msk.f32.mxu1 %vm4707_vm2, %v4706_v40 }
 0x7e0   : > { %v5237_v35 = vpop.f32.mrf.mxu1 }
 0x7e1   : > { %v1431_v30 = vadd.f32 %v3633_v29, %v5237_v35 }
 0x7e2   : > { %v4177_v37 = vpop.f32.mrf.mxu1 }
 0x7e4   : > { %v1422_v38 = vpop.f32.mrf.mxu1 }
 0x7e5   : > { %v3740_v38 = vld [vmem:[%s5667_s8 + $0x2] ss:$0 sm:$0xff] }
 0x7e6   : > { %v4178_v39 = vpop.f32.mrf.mxu1 }
 0x800   : > { %v1652_v42 = vpop.f32.mrf.mxu1 }
 0x801   : > { %v1653_v44 = vadd.f32 %v3677_v41, %v1652_v42 }
 0x802   : > { %v4217_v46 = vpop.f32.mrf.mxu1 }
 0x803   : > { %4240 = vmatpush3.xpose.msk.msra.mxu1 %vm1199_vm3, %v1653_v44  ;;  %v3792_v44 = vld [vmem:[%s5671_s12 + $0x2] ss:$0 sm:$0xff] }
 0x804   : > { %v1655_v48 = vpop.f32.mrf.mxu1  ;;  %4244 = vmatprep.subr.mxu1 %v4706_v40 }
 0x806   : > { %v4218_v50 = vpop.f32.mrf.mxu1  ;;  %4242 = vmatmul.mubr.msk.f32.vlgmr.msra.gmra.mxu1 %vm1199_vm3, %v1540_v47 }
 0x807   : > { %4245 = vmatpush3.msk.msra.mxu1 %vm806_vm1, %v1766_v49  ;;  %4246 = vmatprep.mubr.msk.f32.mxu1 %vm4707_vm2, %v4706_v40  ;;  %v3855_v50 = vld [vmem:[%s5669_s10 + $0x3] ss:$0 sm:$0xff] }
 0x808   : > { %4249 = vmatprep.subr.bf16.mxu1 %v4706_v40 }
 0x8c6   : > { %v1843_v52 = vpop.f32.mrf.mxu1 }
 0x8c7   : > { %v1847_v53 = vsel %vm1276_vm4, %v1843_v52, -inf }
 0x8c8   : > { %1848 = vmax.xlane.f32.xlu0 %v1847_v53  ;;  %v4243_v51 = vpop.f32.mrf.mxu1 }
 0x951   : > { %v1849_v54 = vpop.xlane.xlu0 %1848 }
 0x952   : > { %v1850_v55 = vsub.f32 %v1843_v52, %v1849_v54 }
 0x954   : > { %v1851_v56 = vmul.f32 1.442695, %v1850_v55 }
 0x956   : > { %4621 = vpow2.f32 %v1851_v56 }
 0x963   : > { %v4622_v57 = vpop.eup %4621 }
 0x964   : > { %v1853_v58 = vsel %vm1276_vm4, %v4622_v57, 0.0 }
 0x965   : > { %1854 = vadd.xlane.f32.xlu1 %v1853_v58 }
 0x9ee   : > { %v1855_v59 = vpop.xlane.xlu1 %1854 }
 0x9ef   : > { %4623 = vrcp.f32 %v1855_v59 }
 0x9fc   : > { %v4624_v60 = vpop.eup %4623 }
 0x9fd   : > { %v1857_v62 = vmul.f32 %v4624_v60, %v4622_v57 }
 0x9ff   : > { %4247 = vmatmul.mubr.msk.f32.vlgmr.msra.gmra.mxu1 %vm1288_vm5, %v1857_v62 }
 0xa00   : > { %4250 = vmatpush3.bf16.msra.mxu1 %v4527_v61  ;;  %4253 = vmatprep.mubr.msk.bf16.mxu1 %vm4707_vm2, %v4706_v40 }
 0xa01   : > { %4251 = vmatprep.subr.bf16.mxu1 %v4706_v40 }
 0xa04   : > { %4252 = vmatpush3.bf16.msra.mxu1 %v4528_v63 }
 0xa05   : > { %4257 = vmatprep.subr.bf16.mxu1 %v4706_v40 }
 0xabf   : > { %v1930_v0 = vpop.f32.mrf.mxu1 }
 0xac0   : > { %v1934_v3 = vpack.c.bf16 %v1930_v0, %v1930_v0 }
 0xac1   : > { %v4248_v4 = vpop.f32.mrf.mxu1 }
 0xac2   : > { %4254 = vmatmul.mubr.msk.bf16.vlgmr.msra.gmra.mxu1 %vm1199_vm3, %v1934_v3  ;;  %v4553_v3 = vld [vmem:[%s5672_s13 + $0x28] sm:$0xff]  }
 0xac3   : > { %4258 = vmatpush3.bf16.msra.mxu1 %v4529_v2  ;;  %4273 = vmatprep.mubr.msk.bf16.mxu1 %vm4707_vm2, %v4706_v40 }
 0xac4   : > { %4259 = vmatprep.subr.bf16.mxu1 %v4706_v40 }
 0xac7   : > { %4260 = vmatpush3.bf16.msra.mxu1 %v4530_v5  ;;  %v4554_v5 = vld [vmem:[%s5672_s13 + $0x20] sm:$0xff]  }
 0xac8   : > { %4261 = vmatprep.subr.bf16.mxu1 %v4706_v40 }
 0xacb   : > { %4262 = vmatpush3.bf16.msra.mxu1 %v4531_v6 }
 0xacc   : > { %4263 = vmatprep.subr.bf16.mxu1 %v4706_v40 }
 0xacf   : > { %4264 = vmatpush3.bf16.msra.mxu1 %v4532_v7  ;;  %v4555_v7 = vld [vmem:[%s5666_s7 + $0xf8] sm:$0xff]  }
 0xad0   : > { %4265 = vmatprep.subr.bf16.mxu1 %v4706_v40 }
 0xad3   : > { %4266 = vmatpush3.bf16.msra.mxu1 %v4533_v9 }
 0xad4   : > { %4267 = vmatprep.subr.bf16.mxu1 %v4706_v40 }
 0xad7   : > { %4268 = vmatpush3.bf16.msra.mxu1 %v4534_v10 }
 0xad8   : > { %4269 = vmatprep.subr.bf16.mxu1 %v4706_v40 }
 0xadb   : > { %4270 = vmatpush3.bf16.msra.mxu1 %v4535_v11  ;;  %v4556_v11 = vld [vmem:[%s5666_s7 + $0xf0] sm:$0xff]  }
 0xadc   : > { %4271 = vmatprep.subr.bf16.mxu1 %v4706_v40 }
 0xadf   : > { %4272 = vmatpush3.bf16.msra.mxu1 %v4536_v12  ;;  %v4557_v12 = vld [vmem:[%s5666_s7 + $0xe8] sm:$0xff]  }
 0xae0   : > { %4297 = vmatprep.subr.bf16.mxu1 %v4706_v40 }
 0xae2   : > { %4274 = vmatmul.mubr.bf16.vlgmr.msra.gmra.mxu1 %v5019_v8 }
 0xae3   : > { %4298 = vmatpush3.bf16.msra.mxu1 %v4537_v13  ;;  %4313 = vmatprep.mubr.msk.bf16.mxu1 %vm4707_vm2, %v4706_v40  ;;  %v4558_v13 = vld [vmem:[%s5666_s7 + $0xe0] sm:$0xff]  }
 0xae4   : > { %4299 = vmatprep.subr.bf16.mxu1 %v4706_v40 }
 0xae7   : > { %4300 = vmatpush3.bf16.msra.mxu1 %v4538_v14  ;;  %v4559_v14 = vld [vmem:[%s5666_s7 + $0xd8] sm:$0xff]  }
 0xae8   : > { %4301 = vmatprep.subr.bf16.mxu1 %v4706_v40 }
 0xaeb   : > { %4302 = vmatpush3.bf16.msra.mxu1 %v4539_v15  ;;  %v4560_v15 = vld [vmem:[%s5666_s7 + $0xd0] sm:$0xff]  }
 0xaec   : > { %4303 = vmatprep.subr.bf16.mxu1 %v4706_v40 }
 0xaef   : > { %4304 = vmatpush3.bf16.msra.mxu1 %v4540_v16  ;;  %v4561_v16 = vld [vmem:[%s5666_s7 + $0xc8] sm:$0xff]  }
 0xaf0   : > { %4305 = vmatprep.subr.bf16.mxu1 %v4706_v40 }
 0xaf3   : > { %4306 = vmatpush3.bf16.msra.mxu1 %v4541_v17  ;;  %v4562_v17 = vld [vmem:[%s5666_s7 + $0xc0] sm:$0xff]  }
 0xaf4   : > { %4307 = vmatprep.subr.bf16.mxu1 %v4706_v40 }
 0xaf7   : > { %4308 = vmatpush3.bf16.msra.mxu1 %v4542_v18  ;;  %v4563_v18 = vld [vmem:[%s5670_s11 + $0xf8] sm:$0xff]  }
 0xaf8   : > { %4309 = vmatprep.subr.bf16.mxu1 %v4706_v40 }
 0xafb   : > { %4310 = vmatpush3.bf16.msra.mxu1 %v4543_v19  ;;  %v4564_v19 = vld [vmem:[%s5670_s11 + $0xf0] sm:$0xff]  }
 0xafc   : > { %4311 = vmatprep.subr.bf16.mxu1 %v4706_v40 }
 0xaff   : > { %4312 = vmatpush3.bf16.msra.mxu1 %v4544_v20  ;;  %v4565_v20 = vld [vmem:[%s5670_s11 + $0xe8] sm:$0xff]  }
 0xb00   : > { %4355 = vmatprep.subr.bf16.mxu1 %v4706_v40 }
 0xb02   : > { %4314 = vmatmul.mubr.bf16.vlgmr.msra.gmra.mxu1 %v5019_v8 }
 0xb03   : > { %4356 = vmatpush3.bf16.msra.mxu1 %v4545_v21  ;;  %4371 = vmatprep.mubr.msk.bf16.mxu1 %vm4707_vm2, %v4706_v40  ;;  %v4566_v21 = vld [vmem:[%s5670_s11 + $0xe0] sm:$0xff]  }
 0xb04   : > { %4357 = vmatprep.subr.bf16.mxu1 %v4706_v40 }
 0xb07   : > { %4358 = vmatpush3.bf16.msra.mxu1 %v4546_v22  ;;  %v4567_v22 = vld [vmem:[%s5670_s11 + $0xd8] sm:$0xff]  }
 0xb08   : > { %4359 = vmatprep.subr.bf16.mxu1 %v4706_v40 }
 0xb0b   : > { %4360 = vmatpush3.bf16.msra.mxu1 %v4547_v23  ;;  %v4568_v23 = vld [vmem:[%s5670_s11 + $0xd0] sm:$0xff]  }
 0xb0c   : > { %4361 = vmatprep.subr.bf16.mxu1 %v4706_v40 }
 0xb0f   : > { %4362 = vmatpush3.bf16.msra.mxu1 %v4548_v24  ;;  %v4569_v24 = vld [vmem:[%s5670_s11 + $0xc8] sm:$0xff]  }
 0xb10   : > { %4363 = vmatprep.subr.bf16.mxu1 %v4706_v40 }
 0xb13   : > { %4364 = vmatpush3.bf16.msra.mxu1 %v4549_v25  ;;  %v4570_v25 = vld [vmem:[%s5670_s11 + $0xc0] sm:$0xff]  }
 0xb14   : > { %4365 = vmatprep.subr.bf16.mxu1 %v4706_v40 }
 0xb17   : > { %4366 = vmatpush3.bf16.msra.mxu1 %v4550_v26 }
 0xb18   : > { %4367 = vmatprep.subr.bf16.mxu1 %v4706_v40 }
 0xb1b   : > { %4368 = vmatpush3.bf16.msra.mxu1 %v4551_v27 }
 0xb1c   : > { %4369 = vmatprep.subr.bf16.mxu1 %v4706_v40 }
 0xb1f   : > { %4370 = vmatpush3.bf16.msra.mxu1 %v4552_v28 }
 0xb20   : > { %4395 = vmatprep.subr.mxu1 %v4706_v40 }
 0xb22   : > { %4372 = vmatmul.mubr.bf16.vlgmr.msra.gmra.mxu1 %v5019_v8 }
 0xb23   : > { %4397 = vmatprep.mubr.msk.f32.mxu1 %vm4707_vm2, %v4706_v40 }
 0xb82   : > { %v1989_v31 = vpop.f32.mrf.mxu1 }
 0xb83   : > { %v5382_v32 = vadd.f32 %v1989_v31, %v1431_v30  ;;  %v3829_v31 = vld [vmem:[%s5667_s8 + $0x3] ss:$0 sm:$0xff] }
 0xb84   : > { %v4255_v33 = vpop.f32.mrf.mxu1 }
 0xb86   : > { %v1992_v34 = vpop.f32.mrf.mxu1 }
 0xb88   : > { %v4256_v37 = vpop.f32.mrf.mxu1 }
 0xba2   : > { %v2103_v39 = vpop.f32.mrf.mxu1 }
 0xba3   : > { %v2104_v41 = vadd.f32 %v3740_v38, %v2103_v39 }
 0xba4   : > { %v4275_v42 = vpop.f32.mrf.mxu1 }
 0xba5   : > { %4320 = vmatmul.mubr.msk.f32.vlgmr.msra.gmra.mxu0 %vm1199_vm3, %v2104_v41 }
 0xba6   : > { %v2106_v43 = vpop.f32.mrf.mxu1  ;;  %4324 = vmatprep.mubr.msk.f32.mxu0 %vm4707_vm2, %v4706_v40 }
 0xba8   : > { %v4276_v35 = vpop.f32.mrf.mxu1 }
 0xbc2   : > { %v2329_v45 = vpop.f32.mrf.mxu1 }
 0xbc3   : > { %v2330_v46 = vadd.f32 %v3792_v44, %v2329_v45 }
 0xbc4   : > { %v4315_v47 = vpop.f32.mrf.mxu1 }
 0xbc5   : > { %4323 = vmatpush3.msk.msra.mxu0 %vm806_vm1, %v2330_v46 }
 0xbc6   : > { %v2332_v48 = vpop.f32.mrf.mxu1  ;;  %4327 = vmatprep.subr.bf16.mxu0 %v4706_v40 }
 0xbc8   : > { %v4316_v49 = vpop.f32.mrf.mxu1 }
 0xbe2   : > { %v2780_v52 = vpop.f32.mrf.mxu1 }
 0xbe3   : > { %v2781_v53 = vadd.f32 %v3855_v50, %v2780_v52 }
 0xbe4   : > { %v4373_v51 = vpop.f32.mrf.mxu1 }
 0xbe5   : > { %4396 = vmatpush3.xpose.msk.msra.mxu1 %vm1199_vm3, %v2781_v53 }
 0xbe6   : > { %v2783_v54 = vpop.f32.mrf.mxu1  ;;  %4400 = vmatprep.subr.mxu1 %v4706_v40 }
 0xbe7   : > { %v4571_v54 = vld [vmem:[%s5672_s13 + $0x38] sm:$0xff]  }
 0xbe8   : > { %v4374_v55 = vpop.f32.mrf.mxu1 }
 0xc65   : > { %v2407_v56 = vpop.f32.mrf.mxu0 }
 0xc66   : > { %v2411_v57 = vsel %vm1276_vm4, %v2407_v56, -inf }
 0xc67   : > { %2412 = vmax.xlane.f32.xlu0 %v2411_v57  ;;  %v4321_v58 = vpop.f32.mrf.mxu0 }
 0xcf0   : > { %v2413_v59 = vpop.xlane.xlu0 %2412 }
 0xcf1   : > { %v2414_v60 = vsub.f32 %v2407_v56, %v2413_v59  ;;  %v4572_v56 = vld [vmem:[%s5672_s13 + $0x30] sm:$0xff]  }
 0xcf3   : > { %v2415_v61 = vmul.f32 1.442695, %v2414_v60 }
 0xcf5   : > { %4625 = vpow2.f32 %v2415_v61 }
 0xd02   : > { %v4626_v62 = vpop.eup %4625 }
 0xd03   : > { %v2417_v63 = vsel %vm1276_vm4, %v4626_v62, 0.0 }
 0xd04   : > { %2418 = vadd.xlane.f32.xlu1 %v2417_v63 }
 0xd8d   : > { %v2419_v0 = vpop.xlane.xlu1 %2418 }
 0xd8e   : > { %4627 = vrcp.f32 %v2419_v0 }
 0xd9b   : > { %v4628_v2 = vpop.eup %4627 }
 0xd9c   : > { %v2421_v4 = vmul.f32 %v4628_v2, %v4626_v62 }
 0xd9e   : > { %4325 = vmatmul.mubr.msk.f32.vlgmr.msra.gmra.mxu0 %vm1288_vm5, %v2421_v4  ;;  %v4578_v4 = vld [vmem:[%s5676_s17 + $0x64] ss:$8 sps:$4 sm:$0xff]  }
 0xd9f   : > { %4328 = vmatpush3.bf16.msra.mxu0 %v4553_v3  ;;  %4331 = vmatprep.mubr.msk.bf16.mxu0 %vm4707_vm2, %v4706_v40  ;;  %v4573_v3 = vld [vmem:[%s5676_s17 + $0x70] ss:$8 sps:$4 sm:$0xff]  }
 0xda0   : > { %4329 = vmatprep.subr.bf16.mxu0 %v4706_v40 }
 0xda3   : > { %4330 = vmatpush3.bf16.msra.mxu0 %v4554_v5 }
 0xda4   : > { %4335 = vmatprep.subr.bf16.mxu0 %v4706_v40 }
 0xe5e   : > { %v2494_v6 = vpop.f32.mrf.mxu0 }
 0xe5f   : > { %v2498_v9 = vpack.c.bf16 %v2494_v6, %v2494_v6 }
 0xe60   : > { %v4326_v10 = vpop.f32.mrf.mxu0 }
 0xe61   : > { %4332 = vmatmul.mubr.msk.bf16.vlgmr.msra.gmra.mxu0 %vm1199_vm3, %v2498_v9 }
 0xe62   : > { %4336 = vmatpush3.bf16.msra.mxu0 %v4555_v7  ;;  %4351 = vmatprep.mubr.msk.bf16.mxu0 %vm4707_vm2, %v4706_v40 }
 0xe63   : > { %4337 = vmatprep.subr.bf16.mxu0 %v4706_v40 }
 0xe66   : > { %4338 = vmatpush3.bf16.msra.mxu0 %v4556_v11  ;;  %v4581_v11 = vld [vmem:[%s5676_s17 + $0x54] ss:$8 sps:$4 sm:$0xff]  }
 0xe67   : > { %4339 = vmatprep.subr.bf16.mxu0 %v4706_v40 }
 0xe6a   : > { %4340 = vmatpush3.bf16.msra.mxu0 %v4557_v12  ;;  %v4579_v12 = vld [vmem:[%s5676_s17 + $0x50] ss:$8 sps:$4 sm:$0xff]  }
 0xe6b   : > { %4341 = vmatprep.subr.bf16.mxu0 %v4706_v40 }
 0xe6e   : > { %4342 = vmatpush3.bf16.msra.mxu0 %v4558_v13  ;;  %v4582_v13 = vld [vmem:[%s5676_s17 + $0x40] ss:$8 sps:$4 sm:$0xff]  }
 0xe6f   : > { %4343 = vmatprep.subr.bf16.mxu0 %v4706_v40 }
 0xe72   : > { %4344 = vmatpush3.bf16.msra.mxu0 %v4559_v14  ;;  %v4584_v14 = vld [vmem:[%s5676_s17 + $0x44] ss:$8 sps:$4 sm:$0xff]  }
 0xe73   : > { %4345 = vmatprep.subr.bf16.mxu0 %v4706_v40 }
 0xe76   : > { %4346 = vmatpush3.bf16.msra.mxu0 %v4560_v15  ;;  %v4587_v15 = vld [vmem:[%s5676_s17 + $0x34] ss:$8 sps:$4 sm:$0xff]  }
 0xe77   : > { %4347 = vmatprep.subr.bf16.mxu0 %v4706_v40 }
 0xe7a   : > { %4348 = vmatpush3.bf16.msra.mxu0 %v4561_v16  ;;  %v4585_v16 = vld [vmem:[%s5676_s17 + $0x30] ss:$8 sps:$4 sm:$0xff]  }
 0xe7b   : > { %4349 = vmatprep.subr.bf16.mxu0 %v4706_v40 }
 0xe7e   : > { %4350 = vmatpush3.bf16.msra.mxu0 %v4562_v17  ;;  %v4590_v17 = vld [vmem:[%s5676_s17 + $0x24] ss:$8 sps:$4 sm:$0xff]  }
 0xe7f   : > { %4375 = vmatprep.subr.bf16.mxu0 %v4706_v40 }
 0xe81   : > { %4352 = vmatmul.mubr.bf16.vlgmr.msra.gmra.mxu0 %v5019_v8 }
 0xe82   : > { %4376 = vmatpush3.bf16.msra.mxu0 %v4563_v18  ;;  %4391 = vmatprep.mubr.msk.bf16.mxu0 %vm4707_vm2, %v4706_v40  ;;  %v4588_v18 = vld [vmem:[%s5676_s17 + $0x20] ss:$8 sps:$4 sm:$0xff]  }
 0xe83   : > { %4377 = vmatprep.subr.bf16.mxu0 %v4706_v40 }
 0xe86   : > { %4378 = vmatpush3.bf16.msra.mxu0 %v4564_v19  ;;  %v4593_v19 = vld [vmem:[%s5676_s17 + $0x14] ss:$8 sps:$4 sm:$0xff]  }
 0xe87   : > { %4379 = vmatprep.subr.bf16.mxu0 %v4706_v40 }
 0xe8a   : > { %4380 = vmatpush3.bf16.msra.mxu0 %v4565_v20  ;;  %v4591_v20 = vld [vmem:[%s5676_s17 + $0x10] ss:$8 sps:$4 sm:$0xff]  }
 0xe8b   : > { %4381 = vmatprep.subr.bf16.mxu0 %v4706_v40 }
 0xe8e   : > { %4382 = vmatpush3.bf16.msra.mxu0 %v4566_v21  ;;  %v4596_v21 = vld [vmem:[%s5676_s17 + $0x4] ss:$8 sps:$4 sm:$0xff]  }
 0xe8f   : > { %4383 = vmatprep.subr.bf16.mxu0 %v4706_v40 }
 0xe92   : > { %4384 = vmatpush3.bf16.msra.mxu0 %v4567_v22  ;;  %v4594_v22 = vld [vmem:[%s5676_s17] ss:$8 sps:$4 sm:$0xff]  }
 0xe93   : > { %4385 = vmatprep.subr.bf16.mxu0 %v4706_v40 }
 0xe96   : > { %4386 = vmatpush3.bf16.msra.mxu0 %v4568_v23 }
 0xe97   : > { %4387 = vmatprep.subr.bf16.mxu0 %v4706_v40 }
 0xe9a   : > { %4388 = vmatpush3.bf16.msra.mxu0 %v4569_v24 }
 0xe9b   : > { %4389 = vmatprep.subr.bf16.mxu0 %v4706_v40 }
 0xe9e   : > { %4390 = vmatpush3.bf16.msra.mxu0 %v4570_v25 }
 0xea1   : > { %4392 = vmatmul.mubr.bf16.vlgmr.msra.gmra.mxu0 %v5019_v8 }
 0xf21   : > { %v2553_v26 = vpop.f32.mrf.mxu0 }
 0xf22   : > { %v2559_v27 = vadd.f32 %v2553_v26, %v5382_v32  ;;  %v3881_v32 = vld [vmem:[%s5671_s12 + $0x3] ss:$0 sm:$0xff] }
 0xf23   : > { %v4333_v28 = vpop.f32.mrf.mxu0 }
 0xf25   : > { %v2556_v29 = vpop.f32.mrf.mxu0 }
 0xf26   : > { %v3902_v29 = vld [vmem:[%s5675_s16] ss:$0 sm:$0xff] }
 0xf27   : > { %v4334_v30 = vpop.f32.mrf.mxu0 }
 0xf41   : > { %v2667_v33 = vpop.f32.mrf.mxu0 }
 0xf42   : > { %v2668_v34 = vadd.f32 %v3829_v31, %v2667_v33 }
 0xf43   : > { %v4353_v37 = vpop.f32.mrf.mxu0 }
 0xf44   : > { %4398 = vmatmul.mubr.msk.f32.vlgmr.msra.gmra.mxu1 %vm1199_vm3, %v2668_v34  ;;  %v4597_v34 = vld [vmem:[%s5678_s19 + $0x78] sm:$0xff]  }
 0xf45   : > { %v2670_v38 = vpop.f32.mrf.mxu0  ;;  %4402 = vmatprep.mubr.msk.f32.mxu1 %vm4707_vm2, %v4706_v40  ;;  %v4598_v37 = vld [vmem:[%s5678_s19 + $0x38] sm:$0xff]   ;;  %4079 = vmatprep.subr.bf16.mxu0 %v4597_v34 }
 0xf46   : > { %4080 = vmatpush3.bf16.msra.mxu0 %v4598_v37  ;;  %v4599_v38 = vld [vmem:[%s5678_s19 + $0x70] sm:$0xff]  }
 0xf47   : > { %v4354_v8 = vpop.f32.mrf.mxu0  ;;  %4081 = vmatprep.subr.bf16.mxu0 %v4599_v38 }
 0xf48   : > { %v4600_v8 = vld [vmem:[%s5678_s19 + $0x30] sm:$0xff]  }
 0xf4a   : > { %4082 = vmatpush3.bf16.msra.mxu0 %v4600_v8 }
 0xf61   : > { %v2893_v39 = vpop.f32.mrf.mxu0 }
 0xf62   : > { %v2894_v41 = vadd.f32 %v3881_v32, %v2893_v39  ;;  %v4601_v32 = vld [vmem:[%s5678_s19 + $0x68] sm:$0xff]  }
 0xf63   : > { %v4393_v42 = vpop.f32.mrf.mxu0  ;;  %v4602_v39 = vld [vmem:[%s5678_s19 + $0x28] sm:$0xff]   ;;  %4083 = vmatprep.subr.bf16.mxu0 %v4601_v32 }
 0xf64   : > { %4401 = vmatpush3.msk.msra.mxu1 %vm806_vm1, %v2894_v41  ;;  %4084 = vmatpush3.bf16.msra.mxu0 %v4602_v39  ;;  %v4603_v41 = vld [vmem:[%s5678_s19 + $0x60] sm:$0xff]  }
 0xf65   : > { %v2896_v43 = vpop.f32.mrf.mxu0  ;;  %4405 = vmatprep.subr.bf16.mxu1 %v4706_v40  ;;  %v4604_v42 = vld [vmem:[%s5678_s19 + $0x20] sm:$0xff]   ;;  %4085 = vmatprep.subr.bf16.mxu0 %v4603_v41 }
 0xf66   : > { %v4605_v43 = vld [vmem:[%s5678_s19 + $0x58] sm:$0xff]  }
 0xf67   : > { %v4394_v35 = vpop.f32.mrf.mxu0 }
 0xf68   : > { %4086 = vmatpush3.bf16.msra.mxu0 %v4604_v42  ;;  %v4606_v35 = vld [vmem:[%s5678_s19 + $0x18] sm:$0xff]  }
 0xf69   : > { %4087 = vmatprep.subr.bf16.mxu0 %v4605_v43 }
 0xf6c   : > { %4088 = vmatpush3.bf16.msra.mxu0 %v4606_v35 }
0x1004   : > { %v2971_v44 = vpop.f32.mrf.mxu1 }
0x1005   : > { %v2975_v45 = vsel %vm1276_vm4, %v2971_v44, -inf }
0x1006   : > { %2976 = vmax.xlane.f32.xlu0 %v2975_v45  ;;  %v4399_v46 = vpop.f32.mrf.mxu1  ;;  %v4608_v45 = vld [vmem:[%s5678_s19 + $0x10] sm:$0xff]  }
0x1007   : > { %v4609_v46 = vld [vmem:[%s5678_s19 + $0x48] sm:$0xff]  }
0x108f   : > { %v2977_v47 = vpop.xlane.xlu0 %2976 }
0x1090   : > { %v2978_v48 = vsub.f32 %v2971_v44, %v2977_v47  ;;  %v4607_v44 = vld [vmem:[%s5678_s19 + $0x50] sm:$0xff]   ;;  %v4610_v47 = vld [vmem:[%s5678_s19 + $0x8] sm:$0xff]  }
0x1091   : > { %4089 = vmatprep.subr.bf16.mxu0 %v4607_v44 }
0x1092   : > { %v2979_v49 = vmul.f32 1.442695, %v2978_v48  ;;  %4090 = vmatpush3.bf16.msra.mxu0 %v4608_v45  ;;  %v4611_v48 = vld [vmem:[%s5678_s19 + $0x40] sm:$0xff]  }
0x1093   : > { %4091 = vmatprep.subr.bf16.mxu0 %v4609_v46 }
0x1094   : > { %4629 = vpow2.f32 %v2979_v49  ;;  %v4612_v49 = vld [vmem:[%s5678_s19] sm:$0xff]  }
0x1096   : > { %4092 = vmatpush3.bf16.msra.mxu0 %v4610_v47 }
0x1097   : > { %4093 = vmatprep.subr.bf16.mxu0 %v4611_v48 }
0x109a   : > { %4094 = vmatpush3.bf16.msra.mxu0 %v4612_v49 }
0x10a1   : > { %v4630_v50 = vpop.eup %4629 }
0x10a2   : > { %v2981_v52 = vsel %vm1276_vm4, %v4630_v50, 0.0 }
0x10a3   : > { %2982 = vadd.xlane.f32.xlu1 %v2981_v52 }
0x112c   : > { %v2983_v53 = vpop.xlane.xlu1 %2982 }
0x112d   : > { %4631 = vrcp.f32 %v2983_v53 }
0x113a   : > { %v4632_v51 = vpop.eup %4631 }
0x113b   : > { %v2985_v55 = vmul.f32 %v4632_v51, %v4630_v50  ;;  %v3173_v50 = vlaneseq  ;;  %v3171_v51 = vld [vmem:[%s5677_s18] sm:$0x3] }
0x113d   : > { %4403 = vmatmul.mubr.msk.f32.vlgmr.msra.gmra.mxu1 %vm1288_vm5, %v2985_v55  ;;  %v3174_v52 = vshrl.u32 %v3173_v50, 7 }
0x113e   : > { %4406 = vmatpush3.bf16.msra.mxu1 %v4571_v54  ;;  %4409 = vmatprep.mubr.msk.bf16.mxu1 %vm4707_vm2, %v4706_v40 }
0x113f   : > { %4407 = vmatprep.subr.bf16.mxu1 %v4706_v40  ;;  %v3175_v53 = vsub.s32 0, %v3174_v52  ;;  %v3179_v54 = vsub.s32 1, %v3174_v52 }
0x1141   : > { %v3176_v55 = vrot.slane %v3171_v51, %v3175_v53 }
0x1142   : > { %4408 = vmatpush3.bf16.msra.mxu1 %v4572_v56  ;;  %v3180_v56 = vrot.slane %v3171_v51, %v3179_v54 }
0x11fd   : > { %v3058_v57 = vpop.f32.mrf.mxu1 }
0x11fe   : > { %v3062_v58 = vpack.c.bf16 %v3058_v57, %v3058_v57 }
0x11ff   : > { %v4404_v59 = vpop.f32.mrf.mxu1 }
0x1200   : > { %4410 = vmatmul.mubr.msk.bf16.vlgmr.msra.gmra.mxu1 %vm1199_vm3, %v3062_v58 }
0x1201   : > { %3295 = vmatprep.mubr.bf16.mxu1 %v4705_v1  ;;  %v4575_v1 = vld [vmem:[%s5676_s17 + $0x74] ss:$8 sps:$4 sm:$0xff]  }
0x1202   : > { %3263 = vmatprep.subr.bf16.mxu1 %v4575_v1 }
0x1203   : > { %3264 = vmatpush1.bf16.msra.mxu1 %v4573_v3 }
0x1204   : > { %3265 = vmatprep.subr.bf16.mxu1 %v4578_v4 }
0x12c0   : > { %v3117_v60 = vpop.f32.mrf.mxu1 }
0x12c1   : > { %v3123_v61 = vadd.f32 %v3117_v60, %v2559_v27  ;;  %v3901_v27 = vld [vmem:[%s5674_s15] ss:$0 sm:$0xff] }
0x12c2   : > { %v4411_v62 = vpop.f32.mrf.mxu1 }
0x12c3   : > { %v5510_v63 = vadd.f32 %v3123_v61, %v4931_v36  ;;  %v4576_v36 = vld [vmem:[%s5676_s17 + $0x60] ss:$8 sps:$4 sm:$0xff]  }
0x12c4   : > { %v3120_v0 = vpop.f32.mrf.mxu1  ;;  %3266 = vmatpush1.bf16.msra.mxu1 %v4576_v36 }
0x12c5   : > { %v3127_v40 = vsel %vm806_vm1, %v5510_v63, 0.0  ;;  %3267 = vmatprep.subr.bf16.mxu1 %v4581_v11 }
0x12c6   : > { %3128 = vadd.xlane.f32.xlu0 %v3127_v40  ;;  %v4412_v2 = vpop.f32.mrf.mxu1 }
0x12c8   : > { %3268 = vmatpush1.bf16.msra.mxu1 %v4579_v12 }
0x12c9   : > { %3269 = vmatprep.subr.bf16.mxu1 %v4584_v14 }
0x12cc   : > { %3270 = vmatpush1.bf16.msra.mxu1 %v4582_v13 }
0x12cd   : > { %3271 = vmatprep.subr.bf16.mxu1 %v4587_v15 }
0x12d0   : > { %3272 = vmatpush1.bf16.msra.mxu1 %v4585_v16  ;;  %v3937_v16 = vld [vmem:[%s5679_s20] ss:$0 sm:$0xff] }
0x12d1   : > { %3273 = vmatprep.subr.bf16.mxu1 %v4590_v17 }
0x12d4   : > { %3274 = vmatpush1.bf16.msra.mxu1 %v4588_v18 }
0x12d5   : > { %3275 = vmatprep.subr.bf16.mxu1 %v4593_v19 }
0x12d8   : > { %3276 = vmatpush1.bf16.msra.mxu1 %v4591_v20 }
0x12d9   : > { %3277 = vmatprep.subr.bf16.mxu1 %v4596_v21 }
0x12dc   : > { %3278 = vmatpush1.bf16.msra.mxu1 %v4594_v22 }
0x134f   : > { %v3129_v5 = vpop.xlane.xlu0 %3128 }
0x1350   : > { %v3130_v6 = vmul.f32 0.0078125, %v3129_v5 }
0x1352   : > { %v3131_v7 = vsub.f32 %v5510_v63, %v3130_v6 }
0x1354   : > { %v3132_v9 = vmul.f32 %v3131_v7, %v3131_v7 }
0x1356   : > { %v3133_v10 = vsel %vm806_vm1, %v3132_v9, 0.0 }
0x1357   : > { %3134 = vadd.xlane.f32.xlu1 %v3133_v10 }
0x13e0   : > { %v3135_v23 = vpop.xlane.xlu1 %3134 }
0x13e1   : > { %v3136_v24 = vmul.f32 0.0078125, %v3135_v23 }
0x13e3   : > { %v3137_v25 = vadd.f32 1e-05, %v3136_v24 }
0x13e5   : > { %4633 = vrsqrt.f32 %v3137_v25 }
0x13f2   : > { %v4634_v26 = vpop.eup %4633 }
0x13f3   : > { %v3139_v28 = vmul.f32 %v4634_v26, %v3131_v7 }
0x13f5   : > { %v3146_v30 = vmul.f32 %v3901_v27, %v3139_v28 }
0x13f7   : > { %v3153_v31 = vadd.f32 %v3902_v29, %v3146_v30 }
0x13f9   : > { %v3154_v33 = vpack.c.bf16 %v3153_v31, %v3153_v31 }
0x13fb   : > { %3296 = vmatmul.mubr.bf16.vlgmr.msra.gmra.mxu1 %v3154_v33 }
0x14bb   : > { %v3297_v57 = vpop.f32.mrf.mxu1 }
0x14bc   : > { %v3298_v58 = vadd.f32 %v3297_v57, %v3176_v55 }
0x14bd   : > { %v3299_v59 = vpop.f32.mrf.mxu1 }
0x14be   : > { %v3919_v60 = vmul.f32 -1.702, %v3298_v58  ;;  %v3300_v61 = vadd.f32 %v3299_v59, %v3180_v56 }
0x14bf   : > { %v3301_v62 = vpop.f32.mrf.mxu1 }
0x14c0   : > { %v3308_v0 = vmul.f32 1.442695, %v3919_v60  ;;  %v3920_v40 = vmul.f32 -1.702, %v3300_v61 }
0x14c1   : > { %v3302_v2 = vpop.f32.mrf.mxu1 }
0x14c2   : > { %4635 = vpow2.f32 %v3308_v0  ;;  %v3310_v3 = vmul.f32 1.442695, %v3920_v40 }
0x14c4   : > { %4637 = vpow2.f32 %v3310_v3 }
0x14cf   : > { %v4636_v1 = vpop.eup %4635 }
0x14d0   : > { %v3312_v4 = vadd.f32 1.0, %v4636_v1 }
0x14d1   : > { %v4638_v36 = vpop.eup %4637 }
0x14d2   : > { %4639 = vrcp.f32 %v3312_v4  ;;  %v3313_v5 = vadd.f32 1.0, %v4638_v36 }
0x14d4   : > { %4641 = vrcp.f32 %v3313_v5 }
0x14df   : > { %v4640_v6 = vpop.eup %4639 }
0x14e0   : > { %v3318_v9 = vmul.f32 %v4640_v6, %v3298_v58 }
0x14e1   : > { %v4642_v7 = vpop.eup %4641 }
0x14e2   : > { %v3319_v10 = vmul.f32 %v4642_v7, %v3300_v61  ;;  %v3320_v12 = vpack.c.bf16 %v3318_v9, %v3318_v9 }
0x14e4   : > { %v3321_v11 = vpack.c.bf16 %v3319_v10, %v3319_v10 }
0x14e6   : > { %3482 = vmatprep.mubr.bf16.mxu0 %v3321_v11 }
0x14e7   : > { %3483 = vmatmul.mubr.bf16.vlgmr.msra.gmra.mxu0 %v3320_v12 }
0x15a7   : > { %v4095_v13 = vpop.f32.mrf.mxu0 }
0x15a9   : > { %v4096_v14 = vpop.f32.mrf.mxu0 }
0x15aa   : > { %v4097_v15 = vadd.f32 %v4096_v14, %v4095_v13 }
0x15ab   : > { %v4098_v17 = vpop.f32.mrf.mxu0 }
0x15ac   : > { %v3490_v18 = vadd.f32 %v4097_v15, %v5510_v63 }
0x15ad   : > { %v4099_v19 = vpop.f32.mrf.mxu0 }
0x15ae   : > { %v3498_v20 = vadd.f32 %v3937_v16, %v3490_v18 }
0x15b0   : > { %3499 = vst [vmem:[%s649_s29 - $0x1] sm:$0x1e] %v3498_v20 }
0x15b1   : > { %4656 = shalt.err (!%p4653_p3)
}
0x15b2   : > { %s4657_s0 = scalar_lea.hbm %s3512_s22, 64  ;;  %s4661_s29 = scalar_lea.hbm %s5712_s30, 128 }
0x15b3   : > { %p4658_p4 = scmp.ne.s32.totalorder %s3512_s22, %s4657_s0  ;;  %p4662_p9 = scmp.lt.s32.totalorder %s3512_s22, %s5712_s30 }
0x15b4   : > { %p4663_p10 = scmp.lt.s32.totalorder %s4661_s29, %s4657_s0 }
0x15b5   : > { %p4659_p7 = pnand %p4658_p4, %p4857_p5 }
0x15b6   : > { %p4664_p11 = por %p4663_p10, %p4662_p9 }
0x15b7   : > { %p4660_p8 = pneg %p4659_p7 }
0x15b9   : > { %p4665_p12 = pnand %p4664_p11, %p4660_p8 }
0x15bb   : > { %4668 = shalt.err (!%p4665_p12)
}
0x15bc   : > { %4413 = dma.vmem_to_hbm [thread:$0]  (%p4857_p5), %s3515_s21, 64, %s3512_s22, %s3501_s4  }
0x15bd PF: > { %s5713_s6 = sld [smem:[#allocation7_spill]] }
0x15be   : > { %s5714_s28 = sld [smem:[#allocation5_spill]] }
0x15c3   : > { %p4419_p13 = scmp.ge.s32.totalorder %s5713_s6, 2 }
0x15c4   : > { %s3526_s1 = sand.u32 1, %s5714_s28  }
0x15c5   : > { %p4416_p0 = pnand %p4419_p13, %p4861_p6  ;;  %s3527_s23 = scalar_lea.sflag [#allocation3], %s3526_s1 }
0x15c7   : > { %p4417_p1 = pneg %p4416_p0 }
0x15c9   : > { %4686 = dma.done.wait (%p4417_p1), %s3527_s23, 64  }
0x15ca   : > { %4688 = vsyncadd (%p4417_p1), %s3527_s23, 4294967232  ;;  %s5716_s27 = sld [smem:[#allocation8_spill]]  ;;  %s5719_s2 = smov %s4695_s25 }
0x15cb   : > { %s5717_s0 = sld [smem:[#allocation6_spill]] }
0x15cc   : > { %s5718_s26 = sld [smem:[#allocation9_spill]] }
0x15d0   : > { %p31_p2 = scmp.ge.s32.totalorder %s5716_s27, 4  }
0x15d1   : > { %s5720_s25 = smov %s5717_s0 }
0x15d2   :  { %33 = sbr.rel (!%p31_p2) target bundleno = 12 (0xc), region = 160 }
0x15d7   :  { %3532 = vsyncpa [#allocation3], 1 }
0x15d8   :  { %3534 = vsyncpa [#allocation3 + $0x1], 1 }

</bundles_post_ra>
